<compile_context>
chip_gen: v7x
topology: tpu7x:2x2x1
jax: 0.10.0
libtpu: 0.0.40
codegen_flags: <defaults>
</compile_context>

<pallas_src>
import math
import functools

import jax
import jax.numpy as jnp
from jax import lax
from jax.experimental import pallas as pl
from jax.experimental.pallas import tpu as pltpu


_MIB = 1024 * 1024


def _physical_vmem_bytes():
    try:
        cap = int(pltpu.get_tpu_info().vmem_capacity_bytes)
        if cap > 0:
            return cap
    except Exception:
        pass
    return 64 * _MIB


def _vmem_limit(estimate_bytes, floor=8 * _MIB):
    # Per-generation cap: ~82% of physical VMEM leaves headroom for Mosaic internal
    # scratch and double-buffered I/O blocks (~105 MiB on v5e/v6e, ~52 MiB on v7x).
    cap = int(_physical_vmem_bytes() * 0.82)
    return int(min(max(int(estimate_bytes), floor), cap))


def _gelu_tanh(y):
    # torch.nn.GELU(approximate='tanh'), computed in f32.
    c = math.sqrt(2.0 / math.pi)
    return 0.5 * y * (1.0 + jnp.tanh(c * (y + 0.044715 * y * y * y)))


# ----------------------------------------------------------------------------
# Pallas kernel 1: fused OT path (cdist^2 + hybrid Sinkhorn + barycentric blend)
# ----------------------------------------------------------------------------
def _ot_path_kernel(t_sm, noises_ref, mels_ref, noised_ref, otflow_ref, flow_ref,
                    *, reg, num_iter, num_log_iter, restab_every):
    n = noises_ref[0].astype(jnp.float32)   # [Mel_d, T]
    m = mels_ref[0].astype(jnp.float32)     # [Mel_d, T]
    t = t_sm[pl.program_id(0)]              # scalar schedule time from SMEM

    # Squared euclidean distance between time columns (== torch.cdist(n.mT, m.mT)**2)
    # contracted natively on the MXU in f32 -- no [T, Mel_d] transpose materialized.
    cross = lax.dot_general(n, m, (((0,), (0,)), ((), ())),
                            preferred_element_type=jnp.float32)       # [T, T]
    n_sq = jnp.sum(n * n, axis=0, keepdims=True)                      # [1, T]
    m_sq = jnp.sum(m * m, axis=0, keepdims=True)                      # [1, T]
    d = jnp.maximum(jnp.transpose(n_sq) + m_sq - 2.0 * cross, 0.0)    # [T, T]

    t_n, t_m = d.shape
    mr = -d * (1.0 / reg)
    loga = -math.log(t_n)    # uniform marginal a = 1/T_n
    logb = -math.log(t_m)    # uniform marginal b = 1/T_m
    a_mass = 1.0 / t_n
    b_mass = 1.0 / t_m

    f0 = jnp.zeros((t_n, 1), jnp.float32)
    g0 = jnp.zeros((1, t_m), jnp.float32)

    # Phase 1: a few faithful log-domain iterations absorb the (reg-scaled, huge)
    # cost into the potentials so the exp-domain phase below stays in range.
    def log_body(_, carry):
        f, g = carry
        s = mr + f
        mx = jnp.max(s, axis=0, keepdims=True)
        g = logb - (mx + jnp.log(jnp.sum(jnp.exp(s - mx), axis=0, keepdims=True)))
        s = mr + g
        mx = jnp.max(s, axis=1, keepdims=True)
        f = loga - (mx + jnp.log(jnp.sum(jnp.exp(s - mx), axis=1, keepdims=True)))
        return f, g

    f, g = lax.fori_loop(0, num_log_iter, log_body, (f0, g0))

    # Phase 2: exp-domain matrix scaling on the stabilized kernel.  Each inner
    # iteration is 2*T^2 VPU multiplies + 2 XLU reductions (no transcendentals);
    # the potentials are re-absorbed with a single T^2 exp every `restab_every`
    # iterations.  This is the same fixed-point update sequence as sinkhorn_log.
    def scaled_chunk(f, g, n_inner):
        kmat = jnp.exp(mr + f + g)                                    # [T, T]

        def inner(_, carry):
            alpha, beta = carry
            db = jnp.clip(jnp.sum(kmat * alpha, axis=0, keepdims=True),
                          1e-30, 1e30)                                # [1, T_m]
            beta = b_mass / db
            da = jnp.clip(jnp.sum(kmat * beta, axis=1, keepdims=True),
                          1e-30, 1e30)                                # [T_n, 1]
            alpha = a_mass / da
            return alpha, beta

        alpha0 = jnp.ones((t_n, 1), jnp.float32)
        beta0 = jnp.ones((1, t_m), jnp.float32)
        alpha, beta = lax.fori_loop(0, n_inner, inner, (alpha0, beta0),
                                    unroll=True)
        return f + jnp.log(alpha), g + jnp.log(beta)

    rem = num_iter - num_log_iter
    n_chunks = rem // restab_every
    tail = rem - n_chunks * restab_every

    if n_chunks > 0:
        f, g = lax.fori_loop(
            0, n_chunks,
            lambda _, c: scaled_chunk(c[0], c[1], restab_every),
            (f, g))
    if tail > 0:
        f, g = scaled_chunk(f, g, tail)

    gamma = jnp.exp(mr + f + g)                                       # [T_n, T_m]

    # torch: (noises @ gamma.mT)[d, i] = sum_j n[d, j] * gamma[i, j]
    # -> contract on the second axes of both operands; no gamma.T buffer.
    bary = lax.dot_general(n, gamma, (((1,), (1,)), ((), ())),
                           preferred_element_type=jnp.float32)        # [Mel_d, T]

    noised = t * m + (1.0 - t) * bary
    noised_ref[0] = noised.astype(noised_ref.dtype)
    otflow_ref[0] = (m - noised).astype(otflow_ref.dtype)
    flow_ref[0] = (m - n).astype(flow_ref.dtype)     # flows = mels - noises (fused)


def calc_ot_path(noises, mels, schedule_times, sinkhorn_epsilon=0.01,
                 sinkhorn_num_iter=100):
    """noises, mels: [B, Mel_d, T]; schedule_times: [B].
    Returns (noised_mels, ot_flows, flows)."""
    b, mel_d, t = mels.shape
    kern = functools.partial(
        _ot_path_kernel, reg=sinkhorn_epsilon, num_iter=sinkhorn_num_iter,
        num_log_iter=min(5, sinkhorn_num_iter), restab_every=10)
    # resident footprint: double-buffered I/O blocks (2 in + 3 out) + ~6 live
    # [T,T] f32 intermediates (d/mr, K, gamma, elementwise/exp temporaries).
    est = (20 * mel_d * t + 6 * t * t) * 4 + 2 * _MIB
    noised, otflow, flow = pl.pallas_call(
        kern,
        out_shape=(jax.ShapeDtypeStruct((b, mel_d, t), jnp.float32),
                   jax.ShapeDtypeStruct((b, mel_d, t), jnp.float32),
                   jax.ShapeDtypeStruct((b, mel_d, t), jnp.float32)),
        grid_spec=pltpu.PrefetchScalarGridSpec(
            num_scalar_prefetch=1,
            grid=(b,),
            in_specs=[pl.BlockSpec((1, mel_d, t), lambda i, ts: (i, 0, 0)),
                      pl.BlockSpec((1, mel_d, t), lambda i, ts: (i, 0, 0))],
            out_specs=(pl.BlockSpec((1, mel_d, t), lambda i, ts: (i, 0, 0)),
                       pl.BlockSpec((1, mel_d, t), lambda i, ts: (i, 0, 0)),
                       pl.BlockSpec((1, mel_d, t), lambda i, ts: (i, 0, 0)))),
        compiler_params=pltpu.CompilerParams(
            dimension_semantics=("parallel",),
            vmem_limit_bytes=_vmem_limit(est)),
    )(schedule_times.astype(jnp.float32),
      noises.astype(jnp.float32), mels.astype(jnp.float32))
    return noised, otflow, flow


# ----------------------------------------------------------------------------
# Pallas kernel 2: fused prenet -> proj1 -> proj2 (three 1x1 convs, 2x GELU)
#                  + CFM prediction epilogue (prediction_flows / prediction_noises)
# ----------------------------------------------------------------------------
def _fused_net_pred_kernel(t_sm, x_ref, w1_ref, b1_ref, w2_ref, b2_ref,
                           w3_ref, b3_ref, pflow_ref, pnoise_ref, *, prediction):
    x32 = x_ref[0]                                                 # [C_in, Tt] f32 (noised mels)
    t = jnp.maximum(t_sm[pl.program_id(0)], 1e-7)                  # clamp(1e-07)
    x = x32.astype(jnp.bfloat16)
    # bf16 MXU inputs, f32 accumulation; bias add + GELU in f32 (v5e-safe).
    h = jnp.dot(w1_ref[...], x, preferred_element_type=jnp.float32) + b1_ref[...]
    h = _gelu_tanh(h)                                              # [S, Tt] f32
    h = jnp.dot(w2_ref[...], h.astype(jnp.bfloat16),
                preferred_element_type=jnp.float32) + b2_ref[...]
    h = _gelu_tanh(h)                                              # [S, Tt] f32
    y = jnp.dot(w3_ref[...], h.astype(jnp.bfloat16),
                preferred_element_type=jnp.float32) + b3_ref[...]  # [C_out, Tt]
    if prediction == "Flow":
        pflow = y
        pnoise = x32 - y * t
    elif prediction == "Noise":
        pnoise = y
        pflow = (x32 - y) / t
    else:
        raise NotImplementedError(prediction)
    pflow_ref[0] = pflow.astype(pflow_ref.dtype)
    pnoise_ref[0] = pnoise.astype(pnoise_ref.dtype)


def _pick_time_tile(t_pad):
    # t_pad is a multiple of 128 -> always lane-dense, unmasked stores.
    for tile in (2048, 1792, 1536, 1280, 1024, 896, 768, 640, 512, 384, 256, 128):
        if t_pad % tile == 0:
            return tile
    return t_pad


def fused_network_prediction(noised_mels, schedule_times, p_prenet, p_proj1,
                             p_proj2, prediction="Flow"):
    """prenet (1x1 conv + GELU) -> proj[0] (1x1 conv + GELU) -> proj[1] (1x1 conv)
    fused with the CFM prediction epilogue, all inside one pallas_call.
    noised_mels: [B, C, T] -> (prediction_flows, prediction_noises), both [B, C, T] f32."""
    b, c_in, t = noised_mels.shape
    w1, b1 = p_prenet
    w2, b2 = p_proj1
    w3, b3 = p_proj2
    size = w1.shape[0]
    c_out = w3.shape[0]
    assert c_out == c_in  # epilogue blends y with noised_mels (both n_mel channels)

    # Zero-pad the time axis to a multiple of 128 (1x1 convs are pointwise along
    # time, so padded frames are independent and sliced off afterwards).
    t_pad = max(128, -(-t // 128) * 128)
    x = noised_mels if t_pad == t else jnp.pad(
        noised_mels, ((0, 0), (0, 0), (0, t_pad - t)))
    tile_t = _pick_time_tile(t_pad)
    grid = (b, t_pad // tile_t)

    kern = functools.partial(_fused_net_pred_kernel, prediction=prediction)
    est = ((2 * c_in * 4 + 2 * size * 4 + 4 * c_out * 4) * tile_t
           + 2 * (size * c_in + size * size + c_out * size) * 4
           + 2 * _MIB)
    pflow, pnoise = pl.pallas_call(
        kern,
        out_shape=(jax.ShapeDtypeStruct((b, c_out, t_pad), jnp.float32),
                   jax.ShapeDtypeStruct((b, c_out, t_pad), jnp.float32)),
        grid_spec=pltpu.PrefetchScalarGridSpec(
            num_scalar_prefetch=1,
            grid=grid,
            in_specs=[
                pl.BlockSpec((1, c_in, tile_t), lambda i, j, ts: (i, 0, j)),
                pl.BlockSpec((size, c_in), lambda i, j, ts: (0, 0)),
                pl.BlockSpec((size, 1), lambda i, j, ts: (0, 0)),
                pl.BlockSpec((size, size), lambda i, j, ts: (0, 0)),
                pl.BlockSpec((size, 1), lambda i, j, ts: (0, 0)),
                pl.BlockSpec((c_out, size), lambda i, j, ts: (0, 0)),
                pl.BlockSpec((c_out, 1), lambda i, j, ts: (0, 0)),
            ],
            out_specs=(pl.BlockSpec((1, c_out, tile_t), lambda i, j, ts: (i, 0, j)),
                       pl.BlockSpec((1, c_out, tile_t), lambda i, j, ts: (i, 0, j)))),
        compiler_params=pltpu.CompilerParams(
            dimension_semantics=("parallel", "parallel"),
            vmem_limit_bytes=_vmem_limit(est)),
    )(schedule_times.astype(jnp.float32),
      x.astype(jnp.float32),
      w1.astype(jnp.bfloat16), b1.reshape(size, 1).astype(jnp.float32),
      w2.astype(jnp.bfloat16), b2.reshape(size, 1).astype(jnp.float32),
      w3.astype(jnp.bfloat16), b3.reshape(c_out, 1).astype(jnp.float32))
    if t_pad != t:
        pflow = pflow[..., :t]
        pnoise = pnoise[..., :t]
    return pflow, pnoise


# ----------------------------------------------------------------------------
# Parameter construction (deterministic, shapes follow Network.__init__)
# ----------------------------------------------------------------------------
def init_params(key, n_mel, size):
    def dense(k, out_c, in_c):
        kw, kb = jax.random.split(k)
        w = jax.random.normal(kw, (out_c, in_c), jnp.float32) / math.sqrt(in_c)
        b = 0.01 * jax.random.normal(kb, (out_c,), jnp.float32)
        return w, b

    keys = jax.random.split(key, 3)
    p = {}
    p["prenet"] = dense(keys[0], size, n_mel)
    p["proj1"] = dense(keys[1], size, size)
    p["proj2"] = dense(keys[2], n_mel, size)   # 'zero' gain in source; random here (synthetic)
    # TODO(synk): encoding_ffn / singer_ffn / step_ffn params intentionally omitted --
    # their only consumer (FFT_Block conditional layer-norm) is not defined in the
    # source module, so computing them would be dead kernel launches.
    return p


# ----------------------------------------------------------------------------
# CFM forward
# ----------------------------------------------------------------------------
def cfm_forward(params, key, encodings, singers, mels, lengths, *,
                scheduler="Uniform", use_cfg=True, cfg_alpha=0.1,
                network_prediction="Flow"):
    b = encodings.shape[0]
    k_t, k_n, k_cfg = jax.random.split(key, 3)

    selected_times = jax.random.uniform(k_t, (b,), jnp.float32)
    if scheduler.upper() == "UNIFORM":
        schedule_times = selected_times
    elif scheduler.upper() == "COSMAP":
        schedule_times = 1.0 - 1.0 / (jnp.tan(jnp.pi / 2.0 * selected_times) + 1.0)
    else:
        raise NotImplementedError(scheduler)

    noises = jax.random.normal(k_n, mels.shape, jnp.float32)
    # OT kernel also emits flows = mels - noises (both already resident in VMEM).
    noised_mels, ot_flows, flows = calc_ot_path(noises, mels, schedule_times)

    if use_cfg:
        cfg_filters = (jax.random.uniform(k_cfg, (b,)) > cfg_alpha
                       ).astype(jnp.float32)[:, None, None]
        encodings = encodings * cfg_filters
        singers = singers * cfg_filters

    # TODO(synk): FFT_Block stack (attention) not provided in source -> identity,
    # so the conditions path (encoding/singer/step FFNs) is skipped as dead work.
    del encodings, singers, lengths

    prediction_flows, prediction_noises = fused_network_prediction(
        noised_mels, schedule_times, params["prenet"], params["proj1"],
        params["proj2"], prediction=network_prediction)

    return flows, ot_flows, prediction_flows, noises, prediction_noises


# ----------------------------------------------------------------------------
if __name__ == "__main__":
    B = 2
    N_MEL = 16      # hp.Sound.N_Mel
    ENC_D = 16      # hp.Encoder.Size
    SIZE = 32       # hp.CFM.Size
    DEC_T = 16      # decoder time steps

    root = jax.random.PRNGKey(0)
    k_par, k_enc, k_sng, k_mel, k_fwd = jax.random.split(root, 5)

    params = init_params(k_par, N_MEL, SIZE)
    encodings = jax.random.normal(k_enc, (B, ENC_D, DEC_T), jnp.float32)
    singers = jax.random.normal(k_sng, (B, ENC_D, DEC_T), jnp.float32)
    mels = jax.random.normal(k_mel, (B, N_MEL, DEC_T), jnp.float32)
    lengths = jnp.full((B,), DEC_T, jnp.int32)

    outs = cfm_forward(params, k_fwd, encodings, singers, mels, lengths,
                       scheduler="Uniform", use_cfg=True, cfg_alpha=0.1,
                       network_prediction="Flow")
    outs = jax.block_until_ready(outs)

    flows, ot_flows, pred_flows, noises, pred_noises = outs
    assert flows.shape == (B, N_MEL, DEC_T)
    assert ot_flows.shape == (B, N_MEL, DEC_T)
    assert pred_flows.shape == (B, N_MEL, DEC_T)
    assert pred_noises.shape == (B, N_MEL, DEC_T)
    assert all(bool(jnp.all(jnp.isfinite(o))) for o in outs)
    print("KERNEL_OK")
</pallas_src>

<mosaic_0001>
module attributes {stable_mosaic.version = 11 : i64} {
  func.func @_ot_path_kernel(%arg0: i32, %arg1: memref<2xf32, #tpu.memory_space<smem>>, %arg2: memref<1x16x16xf32, #tpu.memory_space<vmem>>, %arg3: memref<1x16x16xf32, #tpu.memory_space<vmem>>, %arg4: memref<1x16x16xf32, #tpu.memory_space<vmem>>, %arg5: memref<1x16x16xf32, #tpu.memory_space<vmem>>, %arg6: memref<1x16x16xf32, #tpu.memory_space<vmem>>) attributes {dimension_semantics = [#tpu.dimension_semantics<parallel>], iteration_bounds = array<i64: 2>, scalar_prefetch = 1 : i64, scratch_operands = 0 : i64, tpu.core_type = #tpu.core_type<tc>, window_params = [{transform_indices = @transform_0, window_bounds = array<i64: 1, 16, 16>}, {transform_indices = @transform_1, window_bounds = array<i64: 1, 16, 16>}, {transform_indices = @transform_2, window_bounds = array<i64: 1, 16, 16>}, {transform_indices = @transform_3, window_bounds = array<i64: 1, 16, 16>}, {transform_indices = @transform_4, window_bounds = array<i64: 1, 16, 16>}]} {
    %c0 = arith.constant 0 : index
    %c0_0 = arith.constant 0 : index
    %c0_1 = arith.constant 0 : index
    %0 = vector.load %arg2[%c0, %c0_0, %c0_1] : memref<1x16x16xf32, #tpu.memory_space<vmem>>, vector<1x16x16xf32>
    %1 = vector.shape_cast %0 : vector<1x16x16xf32> to vector<16x16xf32>
    %c0_2 = arith.constant 0 : index
    %c0_3 = arith.constant 0 : index
    %c0_4 = arith.constant 0 : index
    %2 = vector.load %arg3[%c0_2, %c0_3, %c0_4] : memref<1x16x16xf32, #tpu.memory_space<vmem>>, vector<1x16x16xf32>
    %3 = vector.shape_cast %2 : vector<1x16x16xf32> to vector<16x16xf32>
    %4 = arith.index_cast %arg0 : i32 to index
    %5 = memref.load %arg1[%4] : memref<2xf32, #tpu.memory_space<smem>>
    %cst = arith.constant dense<0.000000e+00> : vector<16x16xf32>
    %6 = tpu.matmul %1, %3, %cst {dimension_numbers = #tpu.dot_dimension_numbers<[0], [0], [1], [1], [0, 1, 1, 1], [], []>} : vector<16x16xf32>, vector<16x16xf32>, vector<16x16xf32> -> vector<16x16xf32>
    %7 = arith.mulf %1, %1 : vector<16x16xf32>
    %cst_5 = arith.constant dense<0.000000e+00> : vector<16xf32>
    %8 = vector.multi_reduction <add>, %7, %cst_5 [0] : vector<16x16xf32> to vector<16xf32>
    %9 = vector.shape_cast %8 : vector<16xf32> to vector<1x16xf32>
    %10 = arith.mulf %3, %3 : vector<16x16xf32>
    %cst_6 = arith.constant dense<0.000000e+00> : vector<16xf32>
    %11 = vector.multi_reduction <add>, %10, %cst_6 [0] : vector<16x16xf32> to vector<16xf32>
    %12 = vector.shape_cast %11 : vector<16xf32> to vector<1x16xf32>
    %13 = tpu.transpose %9, [1, 0] : vector<1x16xf32> -> vector<16x1xf32>
    %14 = vector.broadcast %13 : vector<16x1xf32> to vector<16x16xf32>
    %15 = vector.broadcast %12 : vector<1x16xf32> to vector<16x16xf32>
    %16 = arith.addf %14, %15 : vector<16x16xf32>
    %cst_7 = arith.constant 2.000000e+00 : f32
    %17 = vector.broadcast %cst_7 : f32 to vector<16x16xf32>
    %18 = arith.mulf %17, %6 : vector<16x16xf32>
    %19 = arith.subf %16, %18 : vector<16x16xf32>
    %cst_8 = arith.constant 0.000000e+00 : f32
    %20 = vector.broadcast %cst_8 : f32 to vector<16x16xf32>
    %21 = arith.maximumf %19, %20 : vector<16x16xf32>
    %cst_9 = arith.constant 0.000000e+00 : f32
    %22 = vector.broadcast %cst_9 : f32 to vector<16x16xf32>
    %23 = arith.subf %22, %21 : vector<16x16xf32>
    %cst_10 = arith.constant 1.000000e+02 : f32
    %24 = vector.broadcast %cst_10 : f32 to vector<16x16xf32>
    %25 = arith.mulf %23, %24 : vector<16x16xf32>
    %cst_11 = arith.constant 0.000000e+00 : f32
    %26 = vector.broadcast %cst_11 : f32 to vector<16x1xf32>
    %cst_12 = arith.constant 0.000000e+00 : f32
    %27 = vector.broadcast %cst_12 : f32 to vector<1x16xf32>
    %c0_i32 = arith.constant 0 : i32
    %c5_i32 = arith.constant 5 : i32
    %28 = arith.addi %c0_i32, %c5_i32 : i32
    %c1_i32 = arith.constant 1 : i32
    %29:2 = scf.for %arg7 = %c0_i32 to %28 step %c1_i32 iter_args(%arg8 = %26, %arg9 = %27) -> (vector<16x1xf32>, vector<1x16xf32>)  : i32 {
      %166 = vector.broadcast %arg8 : vector<16x1xf32> to vector<16x16xf32>
      %167 = arith.addf %25, %166 : vector<16x16xf32>
      %cst_70 = arith.constant dense<0xFF800000> : vector<16xf32>
      %168 = vector.multi_reduction <maximumf>, %167, %cst_70 [0] : vector<16x16xf32> to vector<16xf32>
      %169 = vector.shape_cast %168 : vector<16xf32> to vector<1x16xf32>
      %170 = vector.broadcast %169 : vector<1x16xf32> to vector<16x16xf32>
      %171 = arith.subf %167, %170 : vector<16x16xf32>
      %172 = math.exp %171 : vector<16x16xf32>
      %cst_71 = arith.constant dense<0.000000e+00> : vector<16xf32>
      %173 = vector.multi_reduction <add>, %172, %cst_71 [0] : vector<16x16xf32> to vector<16xf32>
      %174 = vector.shape_cast %173 : vector<16xf32> to vector<1x16xf32>
      %175 = math.log %174 : vector<1x16xf32>
      %176 = arith.addf %169, %175 : vector<1x16xf32>
      %cst_72 = arith.constant -2.77258873 : f32
      %177 = vector.broadcast %cst_72 : f32 to vector<1x16xf32>
      %178 = arith.subf %177, %176 : vector<1x16xf32>
      %179 = vector.broadcast %178 : vector<1x16xf32> to vector<16x16xf32>
      %180 = arith.addf %25, %179 : vector<16x16xf32>
      %cst_73 = arith.constant dense<0xFF800000> : vector<16xf32>
      %181 = vector.multi_reduction <maximumf>, %180, %cst_73 [1] : vector<16x16xf32> to vector<16xf32>
      %182 = vector.shape_cast %181 : vector<16xf32> to vector<16x1xf32>
      %183 = vector.broadcast %182 : vector<16x1xf32> to vector<16x16xf32>
      %184 = arith.subf %180, %183 : vector<16x16xf32>
      %185 = math.exp %184 : vector<16x16xf32>
      %cst_74 = arith.constant dense<0.000000e+00> : vector<16xf32>
      %186 = vector.multi_reduction <add>, %185, %cst_74 [1] : vector<16x16xf32> to vector<16xf32>
      %187 = vector.shape_cast %186 : vector<16xf32> to vector<16x1xf32>
      %188 = math.log %187 : vector<16x1xf32>
      %189 = arith.addf %182, %188 : vector<16x1xf32>
      %cst_75 = arith.constant -2.77258873 : f32
      %190 = vector.broadcast %cst_75 : f32 to vector<16x1xf32>
      %191 = arith.subf %190, %189 : vector<16x1xf32>
      scf.yield %191, %178 : vector<16x1xf32>, vector<1x16xf32>
    }
    %c0_i32_13 = arith.constant 0 : i32
    %c9_i32 = arith.constant 9 : i32
    %30 = arith.addi %c0_i32_13, %c9_i32 : i32
    %c1_i32_14 = arith.constant 1 : i32
    %31:2 = scf.for %arg7 = %c0_i32_13 to %30 step %c1_i32_14 iter_args(%arg8 = %29#0, %arg9 = %29#1) -> (vector<16x1xf32>, vector<1x16xf32>)  : i32 {
      %166 = vector.broadcast %arg8 : vector<16x1xf32> to vector<16x16xf32>
      %167 = arith.addf %25, %166 : vector<16x16xf32>
      %168 = vector.broadcast %arg9 : vector<1x16xf32> to vector<16x16xf32>
      %169 = arith.addf %167, %168 : vector<16x16xf32>
      %170 = math.exp %169 : vector<16x16xf32>
      %cst_70 = arith.constant 1.000000e+00 : f32
      %171 = vector.broadcast %cst_70 : f32 to vector<16x1xf32>
      %cst_71 = arith.constant 1.000000e+00 : f32
      %172 = vector.broadcast %cst_71 : f32 to vector<1x16xf32>
      %c0_i32_72 = arith.constant 0 : i32
      %173 = vector.broadcast %171 : vector<16x1xf32> to vector<16x16xf32>
      %174 = arith.mulf %170, %173 : vector<16x16xf32>
      %cst_73 = arith.constant dense<0.000000e+00> : vector<16xf32>
      %175 = vector.multi_reduction <add>, %174, %cst_73 [0] : vector<16x16xf32> to vector<16xf32>
      %176 = vector.shape_cast %175 : vector<16xf32> to vector<1x16xf32>
      %cst_74 = arith.constant 1.000000e-30 : f32
      %cst_75 = arith.constant 1.000000e+30 : f32
      %177 = vector.broadcast %cst_74 : f32 to vector<1x16xf32>
      %178 = arith.maximumf %177, %176 : vector<1x16xf32>
      %179 = vector.broadcast %cst_75 : f32 to vector<1x16xf32>
      %180 = arith.minimumf %179, %178 : vector<1x16xf32>
      %cst_76 = arith.constant 6.250000e-02 : f32
      %181 = vector.broadcast %cst_76 : f32 to vector<1x16xf32>
      %182 = arith.divf %181, %180 : vector<1x16xf32>
      %183 = vector.broadcast %182 : vector<1x16xf32> to vector<16x16xf32>
      %184 = arith.mulf %170, %183 : vector<16x16xf32>
      %cst_77 = arith.constant dense<0.000000e+00> : vector<16xf32>
      %185 = vector.multi_reduction <add>, %184, %cst_77 [1] : vector<16x16xf32> to vector<16xf32>
      %186 = vector.shape_cast %185 : vector<16xf32> to vector<16x1xf32>
      %cst_78 = arith.constant 1.000000e-30 : f32
      %cst_79 = arith.constant 1.000000e+30 : f32
      %187 = vector.broadcast %cst_78 : f32 to vector<16x1xf32>
      %188 = arith.maximumf %187, %186 : vector<16x1xf32>
      %189 = vector.broadcast %cst_79 : f32 to vector<16x1xf32>
      %190 = arith.minimumf %189, %188 : vector<16x1xf32>
      %cst_80 = arith.constant 6.250000e-02 : f32
      %191 = vector.broadcast %cst_80 : f32 to vector<16x1xf32>
      %192 = arith.divf %191, %190 : vector<16x1xf32>
      %c1_i32_81 = arith.constant 1 : i32
      %193 = vector.broadcast %192 : vector<16x1xf32> to vector<16x16xf32>
      %194 = arith.mulf %170, %193 : vector<16x16xf32>
      %cst_82 = arith.constant dense<0.000000e+00> : vector<16xf32>
      %195 = vector.multi_reduction <add>, %194, %cst_82 [0] : vector<16x16xf32> to vector<16xf32>
      %196 = vector.shape_cast %195 : vector<16xf32> to vector<1x16xf32>
      %cst_83 = arith.constant 1.000000e-30 : f32
      %cst_84 = arith.constant 1.000000e+30 : f32
      %197 = vector.broadcast %cst_83 : f32 to vector<1x16xf32>
      %198 = arith.maximumf %197, %196 : vector<1x16xf32>
      %199 = vector.broadcast %cst_84 : f32 to vector<1x16xf32>
      %200 = arith.minimumf %199, %198 : vector<1x16xf32>
      %cst_85 = arith.constant 6.250000e-02 : f32
      %201 = vector.broadcast %cst_85 : f32 to vector<1x16xf32>
      %202 = arith.divf %201, %200 : vector<1x16xf32>
      %203 = vector.broadcast %202 : vector<1x16xf32> to vector<16x16xf32>
      %204 = arith.mulf %170, %203 : vector<16x16xf32>
      %cst_86 = arith.constant dense<0.000000e+00> : vector<16xf32>
      %205 = vector.multi_reduction <add>, %204, %cst_86 [1] : vector<16x16xf32> to vector<16xf32>
      %206 = vector.shape_cast %205 : vector<16xf32> to vector<16x1xf32>
      %cst_87 = arith.constant 1.000000e-30 : f32
      %cst_88 = arith.constant 1.000000e+30 : f32
      %207 = vector.broadcast %cst_87 : f32 to vector<16x1xf32>
      %208 = arith.maximumf %207, %206 : vector<16x1xf32>
      %209 = vector.broadcast %cst_88 : f32 to vector<16x1xf32>
      %210 = arith.minimumf %209, %208 : vector<16x1xf32>
      %cst_89 = arith.constant 6.250000e-02 : f32
      %211 = vector.broadcast %cst_89 : f32 to vector<16x1xf32>
      %212 = arith.divf %211, %210 : vector<16x1xf32>
      %c2_i32_90 = arith.constant 2 : i32
      %213 = vector.broadcast %212 : vector<16x1xf32> to vector<16x16xf32>
      %214 = arith.mulf %170, %213 : vector<16x16xf32>
      %cst_91 = arith.constant dense<0.000000e+00> : vector<16xf32>
      %215 = vector.multi_reduction <add>, %214, %cst_91 [0] : vector<16x16xf32> to vector<16xf32>
      %216 = vector.shape_cast %215 : vector<16xf32> to vector<1x16xf32>
      %cst_92 = arith.constant 1.000000e-30 : f32
      %cst_93 = arith.constant 1.000000e+30 : f32
      %217 = vector.broadcast %cst_92 : f32 to vector<1x16xf32>
      %218 = arith.maximumf %217, %216 : vector<1x16xf32>
      %219 = vector.broadcast %cst_93 : f32 to vector<1x16xf32>
      %220 = arith.minimumf %219, %218 : vector<1x16xf32>
      %cst_94 = arith.constant 6.250000e-02 : f32
      %221 = vector.broadcast %cst_94 : f32 to vector<1x16xf32>
      %222 = arith.divf %221, %220 : vector<1x16xf32>
      %223 = vector.broadcast %222 : vector<1x16xf32> to vector<16x16xf32>
      %224 = arith.mulf %170, %223 : vector<16x16xf32>
      %cst_95 = arith.constant dense<0.000000e+00> : vector<16xf32>
      %225 = vector.multi_reduction <add>, %224, %cst_95 [1] : vector<16x16xf32> to vector<16xf32>
      %226 = vector.shape_cast %225 : vector<16xf32> to vector<16x1xf32>
      %cst_96 = arith.constant 1.000000e-30 : f32
      %cst_97 = arith.constant 1.000000e+30 : f32
      %227 = vector.broadcast %cst_96 : f32 to vector<16x1xf32>
      %228 = arith.maximumf %227, %226 : vector<16x1xf32>
      %229 = vector.broadcast %cst_97 : f32 to vector<16x1xf32>
      %230 = arith.minimumf %229, %228 : vector<16x1xf32>
      %cst_98 = arith.constant 6.250000e-02 : f32
      %231 = vector.broadcast %cst_98 : f32 to vector<16x1xf32>
      %232 = arith.divf %231, %230 : vector<16x1xf32>
      %c3_i32_99 = arith.constant 3 : i32
      %233 = vector.broadcast %232 : vector<16x1xf32> to vector<16x16xf32>
      %234 = arith.mulf %170, %233 : vector<16x16xf32>
      %cst_100 = arith.constant dense<0.000000e+00> : vector<16xf32>
      %235 = vector.multi_reduction <add>, %234, %cst_100 [0] : vector<16x16xf32> to vector<16xf32>
      %236 = vector.shape_cast %235 : vector<16xf32> to vector<1x16xf32>
      %cst_101 = arith.constant 1.000000e-30 : f32
      %cst_102 = arith.constant 1.000000e+30 : f32
      %237 = vector.broadcast %cst_101 : f32 to vector<1x16xf32>
      %238 = arith.maximumf %237, %236 : vector<1x16xf32>
      %239 = vector.broadcast %cst_102 : f32 to vector<1x16xf32>
      %240 = arith.minimumf %239, %238 : vector<1x16xf32>
      %cst_103 = arith.constant 6.250000e-02 : f32
      %241 = vector.broadcast %cst_103 : f32 to vector<1x16xf32>
      %242 = arith.divf %241, %240 : vector<1x16xf32>
      %243 = vector.broadcast %242 : vector<1x16xf32> to vector<16x16xf32>
      %244 = arith.mulf %170, %243 : vector<16x16xf32>
      %cst_104 = arith.constant dense<0.000000e+00> : vector<16xf32>
      %245 = vector.multi_reduction <add>, %244, %cst_104 [1] : vector<16x16xf32> to vector<16xf32>
      %246 = vector.shape_cast %245 : vector<16xf32> to vector<16x1xf32>
      %cst_105 = arith.constant 1.000000e-30 : f32
      %cst_106 = arith.constant 1.000000e+30 : f32
      %247 = vector.broadcast %cst_105 : f32 to vector<16x1xf32>
      %248 = arith.maximumf %247, %246 : vector<16x1xf32>
      %249 = vector.broadcast %cst_106 : f32 to vector<16x1xf32>
      %250 = arith.minimumf %249, %248 : vector<16x1xf32>
      %cst_107 = arith.constant 6.250000e-02 : f32
      %251 = vector.broadcast %cst_107 : f32 to vector<16x1xf32>
      %252 = arith.divf %251, %250 : vector<16x1xf32>
      %c4_i32_108 = arith.constant 4 : i32
      %253 = vector.broadcast %252 : vector<16x1xf32> to vector<16x16xf32>
      %254 = arith.mulf %170, %253 : vector<16x16xf32>
      %cst_109 = arith.constant dense<0.000000e+00> : vector<16xf32>
      %255 = vector.multi_reduction <add>, %254, %cst_109 [0] : vector<16x16xf32> to vector<16xf32>
      %256 = vector.shape_cast %255 : vector<16xf32> to vector<1x16xf32>
      %cst_110 = arith.constant 1.000000e-30 : f32
      %cst_111 = arith.constant 1.000000e+30 : f32
      %257 = vector.broadcast %cst_110 : f32 to vector<1x16xf32>
      %258 = arith.maximumf %257, %256 : vector<1x16xf32>
      %259 = vector.broadcast %cst_111 : f32 to vector<1x16xf32>
      %260 = arith.minimumf %259, %258 : vector<1x16xf32>
      %cst_112 = arith.constant 6.250000e-02 : f32
      %261 = vector.broadcast %cst_112 : f32 to vector<1x16xf32>
      %262 = arith.divf %261, %260 : vector<1x16xf32>
      %263 = vector.broadcast %262 : vector<1x16xf32> to vector<16x16xf32>
      %264 = arith.mulf %170, %263 : vector<16x16xf32>
      %cst_113 = arith.constant dense<0.000000e+00> : vector<16xf32>
      %265 = vector.multi_reduction <add>, %264, %cst_113 [1] : vector<16x16xf32> to vector<16xf32>
      %266 = vector.shape_cast %265 : vector<16xf32> to vector<16x1xf32>
      %cst_114 = arith.constant 1.000000e-30 : f32
      %cst_115 = arith.constant 1.000000e+30 : f32
      %267 = vector.broadcast %cst_114 : f32 to vector<16x1xf32>
      %268 = arith.maximumf %267, %266 : vector<16x1xf32>
      %269 = vector.broadcast %cst_115 : f32 to vector<16x1xf32>
      %270 = arith.minimumf %269, %268 : vector<16x1xf32>
      %cst_116 = arith.constant 6.250000e-02 : f32
      %271 = vector.broadcast %cst_116 : f32 to vector<16x1xf32>
      %272 = arith.divf %271, %270 : vector<16x1xf32>
      %c5_i32_117 = arith.constant 5 : i32
      %273 = vector.broadcast %272 : vector<16x1xf32> to vector<16x16xf32>
      %274 = arith.mulf %170, %273 : vector<16x16xf32>
      %cst_118 = arith.constant dense<0.000000e+00> : vector<16xf32>
      %275 = vector.multi_reduction <add>, %274, %cst_118 [0] : vector<16x16xf32> to vector<16xf32>
      %276 = vector.shape_cast %275 : vector<16xf32> to vector<1x16xf32>
      %cst_119 = arith.constant 1.000000e-30 : f32
      %cst_120 = arith.constant 1.000000e+30 : f32
      %277 = vector.broadcast %cst_119 : f32 to vector<1x16xf32>
      %278 = arith.maximumf %277, %276 : vector<1x16xf32>
      %279 = vector.broadcast %cst_120 : f32 to vector<1x16xf32>
      %280 = arith.minimumf %279, %278 : vector<1x16xf32>
      %cst_121 = arith.constant 6.250000e-02 : f32
      %281 = vector.broadcast %cst_121 : f32 to vector<1x16xf32>
      %282 = arith.divf %281, %280 : vector<1x16xf32>
      %283 = vector.broadcast %282 : vector<1x16xf32> to vector<16x16xf32>
      %284 = arith.mulf %170, %283 : vector<16x16xf32>
      %cst_122 = arith.constant dense<0.000000e+00> : vector<16xf32>
      %285 = vector.multi_reduction <add>, %284, %cst_122 [1] : vector<16x16xf32> to vector<16xf32>
      %286 = vector.shape_cast %285 : vector<16xf32> to vector<16x1xf32>
      %cst_123 = arith.constant 1.000000e-30 : f32
      %cst_124 = arith.constant 1.000000e+30 : f32
      %287 = vector.broadcast %cst_123 : f32 to vector<16x1xf32>
      %288 = arith.maximumf %287, %286 : vector<16x1xf32>
      %289 = vector.broadcast %cst_124 : f32 to vector<16x1xf32>
      %290 = arith.minimumf %289, %288 : vector<16x1xf32>
      %cst_125 = arith.constant 6.250000e-02 : f32
      %291 = vector.broadcast %cst_125 : f32 to vector<16x1xf32>
      %292 = arith.divf %291, %290 : vector<16x1xf32>
      %c6_i32 = arith.constant 6 : i32
      %293 = vector.broadcast %292 : vector<16x1xf32> to vector<16x16xf32>
      %294 = arith.mulf %170, %293 : vector<16x16xf32>
      %cst_126 = arith.constant dense<0.000000e+00> : vector<16xf32>
      %295 = vector.multi_reduction <add>, %294, %cst_126 [0] : vector<16x16xf32> to vector<16xf32>
      %296 = vector.shape_cast %295 : vector<16xf32> to vector<1x16xf32>
      %cst_127 = arith.constant 1.000000e-30 : f32
      %cst_128 = arith.constant 1.000000e+30 : f32
      %297 = vector.broadcast %cst_127 : f32 to vector<1x16xf32>
      %298 = arith.maximumf %297, %296 : vector<1x16xf32>
      %299 = vector.broadcast %cst_128 : f32 to vector<1x16xf32>
      %300 = arith.minimumf %299, %298 : vector<1x16xf32>
      %cst_129 = arith.constant 6.250000e-02 : f32
      %301 = vector.broadcast %cst_129 : f32 to vector<1x16xf32>
      %302 = arith.divf %301, %300 : vector<1x16xf32>
      %303 = vector.broadcast %302 : vector<1x16xf32> to vector<16x16xf32>
      %304 = arith.mulf %170, %303 : vector<16x16xf32>
      %cst_130 = arith.constant dense<0.000000e+00> : vector<16xf32>
      %305 = vector.multi_reduction <add>, %304, %cst_130 [1] : vector<16x16xf32> to vector<16xf32>
      %306 = vector.shape_cast %305 : vector<16xf32> to vector<16x1xf32>
      %cst_131 = arith.constant 1.000000e-30 : f32
      %cst_132 = arith.constant 1.000000e+30 : f32
      %307 = vector.broadcast %cst_131 : f32 to vector<16x1xf32>
      %308 = arith.maximumf %307, %306 : vector<16x1xf32>
      %309 = vector.broadcast %cst_132 : f32 to vector<16x1xf32>
      %310 = arith.minimumf %309, %308 : vector<16x1xf32>
      %cst_133 = arith.constant 6.250000e-02 : f32
      %311 = vector.broadcast %cst_133 : f32 to vector<16x1xf32>
      %312 = arith.divf %311, %310 : vector<16x1xf32>
      %c7_i32 = arith.constant 7 : i32
      %313 = vector.broadcast %312 : vector<16x1xf32> to vector<16x16xf32>
      %314 = arith.mulf %170, %313 : vector<16x16xf32>
      %cst_134 = arith.constant dense<0.000000e+00> : vector<16xf32>
      %315 = vector.multi_reduction <add>, %314, %cst_134 [0] : vector<16x16xf32> to vector<16xf32>
      %316 = vector.shape_cast %315 : vector<16xf32> to vector<1x16xf32>
      %cst_135 = arith.constant 1.000000e-30 : f32
      %cst_136 = arith.constant 1.000000e+30 : f32
      %317 = vector.broadcast %cst_135 : f32 to vector<1x16xf32>
      %318 = arith.maximumf %317, %316 : vector<1x16xf32>
      %319 = vector.broadcast %cst_136 : f32 to vector<1x16xf32>
      %320 = arith.minimumf %319, %318 : vector<1x16xf32>
      %cst_137 = arith.constant 6.250000e-02 : f32
      %321 = vector.broadcast %cst_137 : f32 to vector<1x16xf32>
      %322 = arith.divf %321, %320 : vector<1x16xf32>
      %323 = vector.broadcast %322 : vector<1x16xf32> to vector<16x16xf32>
      %324 = arith.mulf %170, %323 : vector<16x16xf32>
      %cst_138 = arith.constant dense<0.000000e+00> : vector<16xf32>
      %325 = vector.multi_reduction <add>, %324, %cst_138 [1] : vector<16x16xf32> to vector<16xf32>
      %326 = vector.shape_cast %325 : vector<16xf32> to vector<16x1xf32>
      %cst_139 = arith.constant 1.000000e-30 : f32
      %cst_140 = arith.constant 1.000000e+30 : f32
      %327 = vector.broadcast %cst_139 : f32 to vector<16x1xf32>
      %328 = arith.maximumf %327, %326 : vector<16x1xf32>
      %329 = vector.broadcast %cst_140 : f32 to vector<16x1xf32>
      %330 = arith.minimumf %329, %328 : vector<16x1xf32>
      %cst_141 = arith.constant 6.250000e-02 : f32
      %331 = vector.broadcast %cst_141 : f32 to vector<16x1xf32>
      %332 = arith.divf %331, %330 : vector<16x1xf32>
      %c8_i32 = arith.constant 8 : i32
      %333 = vector.broadcast %332 : vector<16x1xf32> to vector<16x16xf32>
      %334 = arith.mulf %170, %333 : vector<16x16xf32>
      %cst_142 = arith.constant dense<0.000000e+00> : vector<16xf32>
      %335 = vector.multi_reduction <add>, %334, %cst_142 [0] : vector<16x16xf32> to vector<16xf32>
      %336 = vector.shape_cast %335 : vector<16xf32> to vector<1x16xf32>
      %cst_143 = arith.constant 1.000000e-30 : f32
      %cst_144 = arith.constant 1.000000e+30 : f32
      %337 = vector.broadcast %cst_143 : f32 to vector<1x16xf32>
      %338 = arith.maximumf %337, %336 : vector<1x16xf32>
      %339 = vector.broadcast %cst_144 : f32 to vector<1x16xf32>
      %340 = arith.minimumf %339, %338 : vector<1x16xf32>
      %cst_145 = arith.constant 6.250000e-02 : f32
      %341 = vector.broadcast %cst_145 : f32 to vector<1x16xf32>
      %342 = arith.divf %341, %340 : vector<1x16xf32>
      %343 = vector.broadcast %342 : vector<1x16xf32> to vector<16x16xf32>
      %344 = arith.mulf %170, %343 : vector<16x16xf32>
      %cst_146 = arith.constant dense<0.000000e+00> : vector<16xf32>
      %345 = vector.multi_reduction <add>, %344, %cst_146 [1] : vector<16x16xf32> to vector<16xf32>
      %346 = vector.shape_cast %345 : vector<16xf32> to vector<16x1xf32>
      %cst_147 = arith.constant 1.000000e-30 : f32
      %cst_148 = arith.constant 1.000000e+30 : f32
      %347 = vector.broadcast %cst_147 : f32 to vector<16x1xf32>
      %348 = arith.maximumf %347, %346 : vector<16x1xf32>
      %349 = vector.broadcast %cst_148 : f32 to vector<16x1xf32>
      %350 = arith.minimumf %349, %348 : vector<16x1xf32>
      %cst_149 = arith.constant 6.250000e-02 : f32
      %351 = vector.broadcast %cst_149 : f32 to vector<16x1xf32>
      %352 = arith.divf %351, %350 : vector<16x1xf32>
      %c9_i32_150 = arith.constant 9 : i32
      %353 = vector.broadcast %352 : vector<16x1xf32> to vector<16x16xf32>
      %354 = arith.mulf %170, %353 : vector<16x16xf32>
      %cst_151 = arith.constant dense<0.000000e+00> : vector<16xf32>
      %355 = vector.multi_reduction <add>, %354, %cst_151 [0] : vector<16x16xf32> to vector<16xf32>
      %356 = vector.shape_cast %355 : vector<16xf32> to vector<1x16xf32>
      %cst_152 = arith.constant 1.000000e-30 : f32
      %cst_153 = arith.constant 1.000000e+30 : f32
      %357 = vector.broadcast %cst_152 : f32 to vector<1x16xf32>
      %358 = arith.maximumf %357, %356 : vector<1x16xf32>
      %359 = vector.broadcast %cst_153 : f32 to vector<1x16xf32>
      %360 = arith.minimumf %359, %358 : vector<1x16xf32>
      %cst_154 = arith.constant 6.250000e-02 : f32
      %361 = vector.broadcast %cst_154 : f32 to vector<1x16xf32>
      %362 = arith.divf %361, %360 : vector<1x16xf32>
      %363 = vector.broadcast %362 : vector<1x16xf32> to vector<16x16xf32>
      %364 = arith.mulf %170, %363 : vector<16x16xf32>
      %cst_155 = arith.constant dense<0.000000e+00> : vector<16xf32>
      %365 = vector.multi_reduction <add>, %364, %cst_155 [1] : vector<16x16xf32> to vector<16xf32>
      %366 = vector.shape_cast %365 : vector<16xf32> to vector<16x1xf32>
      %cst_156 = arith.constant 1.000000e-30 : f32
      %cst_157 = arith.constant 1.000000e+30 : f32
      %367 = vector.broadcast %cst_156 : f32 to vector<16x1xf32>
      %368 = arith.maximumf %367, %366 : vector<16x1xf32>
      %369 = vector.broadcast %cst_157 : f32 to vector<16x1xf32>
      %370 = arith.minimumf %369, %368 : vector<16x1xf32>
      %cst_158 = arith.constant 6.250000e-02 : f32
      %371 = vector.broadcast %cst_158 : f32 to vector<16x1xf32>
      %372 = arith.divf %371, %370 : vector<16x1xf32>
      %373 = math.log %372 : vector<16x1xf32>
      %374 = arith.addf %arg8, %373 : vector<16x1xf32>
      %375 = math.log %362 : vector<1x16xf32>
      %376 = arith.addf %arg9, %375 : vector<1x16xf32>
      scf.yield %374, %376 : vector<16x1xf32>, vector<1x16xf32>
    }
    %32 = vector.broadcast %31#0 : vector<16x1xf32> to vector<16x16xf32>
    %33 = arith.addf %25, %32 : vector<16x16xf32>
    %34 = vector.broadcast %31#1 : vector<1x16xf32> to vector<16x16xf32>
    %35 = arith.addf %33, %34 : vector<16x16xf32>
    %36 = math.exp %35 : vector<16x16xf32>
    %cst_15 = arith.constant 1.000000e+00 : f32
    %37 = vector.broadcast %cst_15 : f32 to vector<16x1xf32>
    %cst_16 = arith.constant 1.000000e+00 : f32
    %38 = vector.broadcast %cst_16 : f32 to vector<1x16xf32>
    %c0_i32_17 = arith.constant 0 : i32
    %39 = vector.broadcast %37 : vector<16x1xf32> to vector<16x16xf32>
    %40 = arith.mulf %36, %39 : vector<16x16xf32>
    %cst_18 = arith.constant dense<0.000000e+00> : vector<16xf32>
    %41 = vector.multi_reduction <add>, %40, %cst_18 [0] : vector<16x16xf32> to vector<16xf32>
    %42 = vector.shape_cast %41 : vector<16xf32> to vector<1x16xf32>
    %cst_19 = arith.constant 1.000000e-30 : f32
    %cst_20 = arith.constant 1.000000e+30 : f32
    %43 = vector.broadcast %cst_19 : f32 to vector<1x16xf32>
    %44 = arith.maximumf %43, %42 : vector<1x16xf32>
    %45 = vector.broadcast %cst_20 : f32 to vector<1x16xf32>
    %46 = arith.minimumf %45, %44 : vector<1x16xf32>
    %cst_21 = arith.constant 6.250000e-02 : f32
    %47 = vector.broadcast %cst_21 : f32 to vector<1x16xf32>
    %48 = arith.divf %47, %46 : vector<1x16xf32>
    %49 = vector.broadcast %48 : vector<1x16xf32> to vector<16x16xf32>
    %50 = arith.mulf %36, %49 : vector<16x16xf32>
    %cst_22 = arith.constant dense<0.000000e+00> : vector<16xf32>
    %51 = vector.multi_reduction <add>, %50, %cst_22 [1] : vector<16x16xf32> to vector<16xf32>
    %52 = vector.shape_cast %51 : vector<16xf32> to vector<16x1xf32>
    %cst_23 = arith.constant 1.000000e-30 : f32
    %cst_24 = arith.constant 1.000000e+30 : f32
    %53 = vector.broadcast %cst_23 : f32 to vector<16x1xf32>
    %54 = arith.maximumf %53, %52 : vector<16x1xf32>
    %55 = vector.broadcast %cst_24 : f32 to vector<16x1xf32>
    %56 = arith.minimumf %55, %54 : vector<16x1xf32>
    %cst_25 = arith.constant 6.250000e-02 : f32
    %57 = vector.broadcast %cst_25 : f32 to vector<16x1xf32>
    %58 = arith.divf %57, %56 : vector<16x1xf32>
    %c1_i32_26 = arith.constant 1 : i32
    %59 = vector.broadcast %58 : vector<16x1xf32> to vector<16x16xf32>
    %60 = arith.mulf %36, %59 : vector<16x16xf32>
    %cst_27 = arith.constant dense<0.000000e+00> : vector<16xf32>
    %61 = vector.multi_reduction <add>, %60, %cst_27 [0] : vector<16x16xf32> to vector<16xf32>
    %62 = vector.shape_cast %61 : vector<16xf32> to vector<1x16xf32>
    %cst_28 = arith.constant 1.000000e-30 : f32
    %cst_29 = arith.constant 1.000000e+30 : f32
    %63 = vector.broadcast %cst_28 : f32 to vector<1x16xf32>
    %64 = arith.maximumf %63, %62 : vector<1x16xf32>
    %65 = vector.broadcast %cst_29 : f32 to vector<1x16xf32>
    %66 = arith.minimumf %65, %64 : vector<1x16xf32>
    %cst_30 = arith.constant 6.250000e-02 : f32
    %67 = vector.broadcast %cst_30 : f32 to vector<1x16xf32>
    %68 = arith.divf %67, %66 : vector<1x16xf32>
    %69 = vector.broadcast %68 : vector<1x16xf32> to vector<16x16xf32>
    %70 = arith.mulf %36, %69 : vector<16x16xf32>
    %cst_31 = arith.constant dense<0.000000e+00> : vector<16xf32>
    %71 = vector.multi_reduction <add>, %70, %cst_31 [1] : vector<16x16xf32> to vector<16xf32>
    %72 = vector.shape_cast %71 : vector<16xf32> to vector<16x1xf32>
    %cst_32 = arith.constant 1.000000e-30 : f32
    %cst_33 = arith.constant 1.000000e+30 : f32
    %73 = vector.broadcast %cst_32 : f32 to vector<16x1xf32>
    %74 = arith.maximumf %73, %72 : vector<16x1xf32>
    %75 = vector.broadcast %cst_33 : f32 to vector<16x1xf32>
    %76 = arith.minimumf %75, %74 : vector<16x1xf32>
    %cst_34 = arith.constant 6.250000e-02 : f32
    %77 = vector.broadcast %cst_34 : f32 to vector<16x1xf32>
    %78 = arith.divf %77, %76 : vector<16x1xf32>
    %c2_i32 = arith.constant 2 : i32
    %79 = vector.broadcast %78 : vector<16x1xf32> to vector<16x16xf32>
    %80 = arith.mulf %36, %79 : vector<16x16xf32>
    %cst_35 = arith.constant dense<0.000000e+00> : vector<16xf32>
    %81 = vector.multi_reduction <add>, %80, %cst_35 [0] : vector<16x16xf32> to vector<16xf32>
    %82 = vector.shape_cast %81 : vector<16xf32> to vector<1x16xf32>
    %cst_36 = arith.constant 1.000000e-30 : f32
    %cst_37 = arith.constant 1.000000e+30 : f32
    %83 = vector.broadcast %cst_36 : f32 to vector<1x16xf32>
    %84 = arith.maximumf %83, %82 : vector<1x16xf32>
    %85 = vector.broadcast %cst_37 : f32 to vector<1x16xf32>
    %86 = arith.minimumf %85, %84 : vector<1x16xf32>
    %cst_38 = arith.constant 6.250000e-02 : f32
    %87 = vector.broadcast %cst_38 : f32 to vector<1x16xf32>
    %88 = arith.divf %87, %86 : vector<1x16xf32>
    %89 = vector.broadcast %88 : vector<1x16xf32> to vector<16x16xf32>
    %90 = arith.mulf %36, %89 : vector<16x16xf32>
    %cst_39 = arith.constant dense<0.000000e+00> : vector<16xf32>
    %91 = vector.multi_reduction <add>, %90, %cst_39 [1] : vector<16x16xf32> to vector<16xf32>
    %92 = vector.shape_cast %91 : vector<16xf32> to vector<16x1xf32>
    %cst_40 = arith.constant 1.000000e-30 : f32
    %cst_41 = arith.constant 1.000000e+30 : f32
    %93 = vector.broadcast %cst_40 : f32 to vector<16x1xf32>
    %94 = arith.maximumf %93, %92 : vector<16x1xf32>
    %95 = vector.broadcast %cst_41 : f32 to vector<16x1xf32>
    %96 = arith.minimumf %95, %94 : vector<16x1xf32>
    %cst_42 = arith.constant 6.250000e-02 : f32
    %97 = vector.broadcast %cst_42 : f32 to vector<16x1xf32>
    %98 = arith.divf %97, %96 : vector<16x1xf32>
    %c3_i32 = arith.constant 3 : i32
    %99 = vector.broadcast %98 : vector<16x1xf32> to vector<16x16xf32>
    %100 = arith.mulf %36, %99 : vector<16x16xf32>
    %cst_43 = arith.constant dense<0.000000e+00> : vector<16xf32>
    %101 = vector.multi_reduction <add>, %100, %cst_43 [0] : vector<16x16xf32> to vector<16xf32>
    %102 = vector.shape_cast %101 : vector<16xf32> to vector<1x16xf32>
    %cst_44 = arith.constant 1.000000e-30 : f32
    %cst_45 = arith.constant 1.000000e+30 : f32
    %103 = vector.broadcast %cst_44 : f32 to vector<1x16xf32>
    %104 = arith.maximumf %103, %102 : vector<1x16xf32>
    %105 = vector.broadcast %cst_45 : f32 to vector<1x16xf32>
    %106 = arith.minimumf %105, %104 : vector<1x16xf32>
    %cst_46 = arith.constant 6.250000e-02 : f32
    %107 = vector.broadcast %cst_46 : f32 to vector<1x16xf32>
    %108 = arith.divf %107, %106 : vector<1x16xf32>
    %109 = vector.broadcast %108 : vector<1x16xf32> to vector<16x16xf32>
    %110 = arith.mulf %36, %109 : vector<16x16xf32>
    %cst_47 = arith.constant dense<0.000000e+00> : vector<16xf32>
    %111 = vector.multi_reduction <add>, %110, %cst_47 [1] : vector<16x16xf32> to vector<16xf32>
    %112 = vector.shape_cast %111 : vector<16xf32> to vector<16x1xf32>
    %cst_48 = arith.constant 1.000000e-30 : f32
    %cst_49 = arith.constant 1.000000e+30 : f32
    %113 = vector.broadcast %cst_48 : f32 to vector<16x1xf32>
    %114 = arith.maximumf %113, %112 : vector<16x1xf32>
    %115 = vector.broadcast %cst_49 : f32 to vector<16x1xf32>
    %116 = arith.minimumf %115, %114 : vector<16x1xf32>
    %cst_50 = arith.constant 6.250000e-02 : f32
    %117 = vector.broadcast %cst_50 : f32 to vector<16x1xf32>
    %118 = arith.divf %117, %116 : vector<16x1xf32>
    %c4_i32 = arith.constant 4 : i32
    %119 = vector.broadcast %118 : vector<16x1xf32> to vector<16x16xf32>
    %120 = arith.mulf %36, %119 : vector<16x16xf32>
    %cst_51 = arith.constant dense<0.000000e+00> : vector<16xf32>
    %121 = vector.multi_reduction <add>, %120, %cst_51 [0] : vector<16x16xf32> to vector<16xf32>
    %122 = vector.shape_cast %121 : vector<16xf32> to vector<1x16xf32>
    %cst_52 = arith.constant 1.000000e-30 : f32
    %cst_53 = arith.constant 1.000000e+30 : f32
    %123 = vector.broadcast %cst_52 : f32 to vector<1x16xf32>
    %124 = arith.maximumf %123, %122 : vector<1x16xf32>
    %125 = vector.broadcast %cst_53 : f32 to vector<1x16xf32>
    %126 = arith.minimumf %125, %124 : vector<1x16xf32>
    %cst_54 = arith.constant 6.250000e-02 : f32
    %127 = vector.broadcast %cst_54 : f32 to vector<1x16xf32>
    %128 = arith.divf %127, %126 : vector<1x16xf32>
    %129 = vector.broadcast %128 : vector<1x16xf32> to vector<16x16xf32>
    %130 = arith.mulf %36, %129 : vector<16x16xf32>
    %cst_55 = arith.constant dense<0.000000e+00> : vector<16xf32>
    %131 = vector.multi_reduction <add>, %130, %cst_55 [1] : vector<16x16xf32> to vector<16xf32>
    %132 = vector.shape_cast %131 : vector<16xf32> to vector<16x1xf32>
    %cst_56 = arith.constant 1.000000e-30 : f32
    %cst_57 = arith.constant 1.000000e+30 : f32
    %133 = vector.broadcast %cst_56 : f32 to vector<16x1xf32>
    %134 = arith.maximumf %133, %132 : vector<16x1xf32>
    %135 = vector.broadcast %cst_57 : f32 to vector<16x1xf32>
    %136 = arith.minimumf %135, %134 : vector<16x1xf32>
    %cst_58 = arith.constant 6.250000e-02 : f32
    %137 = vector.broadcast %cst_58 : f32 to vector<16x1xf32>
    %138 = arith.divf %137, %136 : vector<16x1xf32>
    %139 = math.log %138 : vector<16x1xf32>
    %140 = arith.addf %31#0, %139 : vector<16x1xf32>
    %141 = math.log %128 : vector<1x16xf32>
    %142 = arith.addf %31#1, %141 : vector<1x16xf32>
    %143 = vector.broadcast %140 : vector<16x1xf32> to vector<16x16xf32>
    %144 = arith.addf %25, %143 : vector<16x16xf32>
    %145 = vector.broadcast %142 : vector<1x16xf32> to vector<16x16xf32>
    %146 = arith.addf %144, %145 : vector<16x16xf32>
    %147 = math.exp %146 : vector<16x16xf32>
    %cst_59 = arith.constant dense<0.000000e+00> : vector<16x16xf32>
    %148 = tpu.matmul %1, %147, %cst_59 {dimension_numbers = #tpu.dot_dimension_numbers<[1], [1], [0], [0], [0, 0, 1, 0], [], []>} : vector<16x16xf32>, vector<16x16xf32>, vector<16x16xf32> -> vector<16x16xf32>
    %149 = vector.broadcast %5 : f32 to vector<16x16xf32>
    %150 = arith.mulf %149, %3 : vector<16x16xf32>
    %cst_60 = arith.constant 1.000000e+00 : f32
    %151 = arith.subf %cst_60, %5 : f32
    %152 = vector.broadcast %151 : f32 to vector<16x16xf32>
    %153 = arith.mulf %152, %148 : vector<16x16xf32>
    %154 = arith.addf %150, %153 : vector<16x16xf32>
    %c0_61 = arith.constant 0 : index
    %c0_62 = arith.constant 0 : index
    %c0_63 = arith.constant 0 : index
    %155 = vector.load %arg4[%c0_61, %c0_62, %c0_63] : memref<1x16x16xf32, #tpu.memory_space<vmem>>, vector<1x16x16xf32>
    %156 = vector.shape_cast %155 : vector<1x16x16xf32> to vector<16x16xf32>
    %157 = vector.shape_cast %154 : vector<16x16xf32> to vector<1x16x16xf32>
    tpu.vector_store %arg4[%c0_61, %c0_62, %c0_63], %157 {strides = array<i32>} : memref<1x16x16xf32, #tpu.memory_space<vmem>>, vector<1x16x16xf32>,
    %158 = arith.subf %3, %154 : vector<16x16xf32>
    %c0_64 = arith.constant 0 : index
    %c0_65 = arith.constant 0 : index
    %c0_66 = arith.constant 0 : index
    %159 = vector.load %arg5[%c0_64, %c0_65, %c0_66] : memref<1x16x16xf32, #tpu.memory_space<vmem>>, vector<1x16x16xf32>
    %160 = vector.shape_cast %159 : vector<1x16x16xf32> to vector<16x16xf32>
    %161 = vector.shape_cast %158 : vector<16x16xf32> to vector<1x16x16xf32>
    tpu.vector_store %arg5[%c0_64, %c0_65, %c0_66], %161 {strides = array<i32>} : memref<1x16x16xf32, #tpu.memory_space<vmem>>, vector<1x16x16xf32>,
    %162 = arith.subf %3, %1 : vector<16x16xf32>
    %c0_67 = arith.constant 0 : index
    %c0_68 = arith.constant 0 : index
    %c0_69 = arith.constant 0 : index
    %163 = vector.load %arg6[%c0_67, %c0_68, %c0_69] : memref<1x16x16xf32, #tpu.memory_space<vmem>>, vector<1x16x16xf32>
    %164 = vector.shape_cast %163 : vector<1x16x16xf32> to vector<16x16xf32>
    %165 = vector.shape_cast %162 : vector<16x16xf32> to vector<1x16x16xf32>
    tpu.vector_store %arg6[%c0_67, %c0_68, %c0_69], %165 {strides = array<i32>} : memref<1x16x16xf32, #tpu.memory_space<vmem>>, vector<1x16x16xf32>,
    return
  }
  func.func @transform_0(%arg0: i32, %arg1: memref<2xf32, #tpu.memory_space<smem>>) -> (i32, i32, i32) {
    %c0_i32 = arith.constant 0 : i32
    %c0_i32_0 = arith.constant 0 : i32
    %c0_i32_1 = arith.constant 0 : i32
    return %arg0, %c0_i32, %c0_i32_0 : i32, i32, i32
  }
  func.func @transform_1(%arg0: i32, %arg1: memref<2xf32, #tpu.memory_space<smem>>) -> (i32, i32, i32) {
    %c0_i32 = arith.constant 0 : i32
    %c0_i32_0 = arith.constant 0 : i32
    %c0_i32_1 = arith.constant 0 : i32
    return %arg0, %c0_i32, %c0_i32_0 : i32, i32, i32
  }
  func.func @transform_2(%arg0: i32, %arg1: memref<2xf32, #tpu.memory_space<smem>>) -> (i32, i32, i32) {
    %c0_i32 = arith.constant 0 : i32
    %c0_i32_0 = arith.constant 0 : i32
    %c0_i32_1 = arith.constant 0 : i32
    return %arg0, %c0_i32, %c0_i32_0 : i32, i32, i32
  }
  func.func @transform_3(%arg0: i32, %arg1: memref<2xf32, #tpu.memory_space<smem>>) -> (i32, i32, i32) {
    %c0_i32 = arith.constant 0 : i32
    %c0_i32_0 = arith.constant 0 : i32
    %c0_i32_1 = arith.constant 0 : i32
    return %arg0, %c0_i32, %c0_i32_0 : i32, i32, i32
  }
  func.func @transform_4(%arg0: i32, %arg1: memref<2xf32, #tpu.memory_space<smem>>) -> (i32, i32, i32) {
    %c0_i32 = arith.constant 0 : i32
    %c0_i32_0 = arith.constant 0 : i32
    %c0_i32_1 = arith.constant 0 : i32
    return %arg0, %c0_i32, %c0_i32_0 : i32, i32, i32
  }
}

</mosaic_0001>

<bundles_post_ra>
// kernel: tpu_custom_call.1
= control target key start
LH: loop header
LB: loop body
LE: loop exit
PB: predicated region body
PF: predicated region fallthrough
CT: control target
= control target key end

     0   :  { %s2628_s0 = inlined_call_operand.hbm [shape: f32[2], index: 0, kind: input, shape index: {}]   ;;  %s2629_s1 = inlined_call_operand.hbm [shape: f32[2,16,16], index: 1, kind: input, shape index: {}]   ;;  %s2630_s2 = inlined_call_operand.hbm [shape: f32[2,16,16], index: 2, kind: input, shape index: {}]   ;;  %s2631_s3 = inlined_call_operand.hbm [shape: f32[2,16,16], index: 3, kind: output, shape index: {0}]   ;;  %s2632_s4 = inlined_call_operand.hbm [shape: f32[2,16,16], index: 4, kind: output, shape index: {1}]   ;;  %s2633_s5 = inlined_call_operand.hbm [shape: f32[2,16,16], index: 5, kind: output, shape index: {2}]  }
   0x1   :  { %s1723_s20 = scalar_lea.hbm %s2628_s0, 16 }
   0x2   :  { %p1724_p0 = scmp.ne.s32.totalorder %s2628_s0, %s1723_s20  ;;  %p1727_p1 = scmp.lt.u32.totalorder %s1723_s20, %s2628_s0 }
   0x4   :  { %p1729_p2 = pnand %p1727_p1, %p1724_p0 }
   0x6   :  { %1732 = shalt.err (!%p1729_p2)  }
   0x7   :  { %s1983_s25 = smov [#allocation3]  }
   0x8   :  { %12 = dma.hbm_to_smem %s2628_s0, 16, %s1983_s25, [#allocation2] }
   0x9   :  { %1921 = dma.done.wait [#allocation2], 16 }
   0xa   :  { %1922 = vsyncadd [#allocation2], 4294967280 }
   0xb   :  { %14 = sfence }
   0xc   :  { %15 = vsyncpa [#allocation5], 0 }
   0xd   :  { %17 = vsyncpa [#allocation5 + $0x1], 0 }
   0xe   :  { %18 = vsyncpa [#allocation8], 0 }
   0xf   :  { %20 = vsyncpa [#allocation8 + $0x1], 0 }
  0x10   :  { %21 = vsyncpa [#allocation6], 0 }
  0x11   :  { %23 = vsyncpa [#allocation6 + $0x1], 0 }
  0x12   :  { %24 = vsyncpa [#allocation11], 0 }
  0x13   :  { %26 = vsyncpa [#allocation11 + $0x1], 0  ;;  %s2036_s28 = smov 0   ;;  %s2038_s29 = smov 0  }
  0x14   :  { %s2040_s30 = smov 0   ;;  %s2042_s6 = smov 0  }
  0x15 LB: > { %s2057_s0 = sadd.s32 4294967295, %s1953_s6   ;;  %s2635_s7 = sadd.s32 4294967294, %s1953_s6   ;;  %s1953_s6 = sphi %s2042_s6, %s2660_s6   ;;  %s1949_s30 = sphi %s2040_s30, %s2659_s30   ;;  %s1945_s29 = sphi %s2038_s29, %s2658_s29   ;;  %s1941_s28 = sphi %s2036_s28, %s2657_s28  }
  0x16   : > { %s2061_s8 = sadd.s32 1, %s1953_s6   ;;  %s39_s9 = sadd.s32 1, %s1949_s30 }
  0x17   : > { %s36_s10 = ssub.s32 %s1953_s6, %s2061_s8  ;;  %p46_p3 = scmp.ne.s32.totalorder %s1949_s30, %s1945_s29 }
  0x18   : > { %p37_p4 = scmp.eq.s32.totalorder %s36_s10, 0  ;;  %p47_p5 = scmp.eq.s32.totalorder %s1953_s6, 0 }
  0x19   : > { %p52_p6 = scmp.ne.s32.totalorder %s1945_s29, %s1941_s28  ;;  %p53_p7 = scmp.eq.s32.totalorder %s2057_s0, 0 }
  0x1a   : > { %s2073_s11 = scalar_select %p37_p4, %s1949_s30, %s39_s9  }
  0x1b   : > { %p2075_p8 = por %p47_p5, %p46_p3  ;;  %p2079_p9 = por %p53_p7, %p52_p6 }
  0x1c   : > { %p102_p10 = scmp.eq.s32.totalorder %s2057_s0, 1  ;;  %p108_p11 = scmp.eq.s32.totalorder %s2635_s7, 1 }
  0x1d   : > { %s2638_s13 = scalar_select %p2079_p9, 1, 0 }
  0x1e   : > { %p1496_p13 = scmp.lt.s32.totalorder %s1953_s6, 2  ;;  %p2088_p0 = por %p102_p10, %p46_p3 }
  0x1f   : > { %p2092_p1 = por %p108_p11, %p52_p6  ;;  %s2097_s16 = sand.u32 1, %s1949_s30  }
  0x20   : > { %s2639_s14 = scalar_select %p2088_p0, 1, 0 }
  0x21   : > { %s2640_s15 = scalar_select %p2092_p1, 1, 0 }
  0x22   : > { %s1432_s17 = sshll.u32 %s1953_s6, 8  ;;  %s1403_s18 = sshll.u32 %s2097_s16, 4 }
  0x23   : > { %s2106_s21 = scalar_lea.hbm %s2629_s1, %s1432_s17  ;;  %s184_s22 = scalar_lea.vmem [#allocation4], %s1403_s18 }
  0x24   : > { %s191_s23 = sshll.u32 %s184_s22, 4  ;;  %p2112_p2 = pnand %p1496_p13, %p2075_p8  ;;  %s2116_s23 = int_to_ptr.vmem [resolvable:$true] %s191_s23 }
  0x25   : > { %s181_s25 = scalar_lea.sflag [#allocation5], %s2097_s16  ;;  %s1733_s26 = scalar_lea.hbm %s2106_s21, 256 }
  0x26   : > { %p1734_p3 = scmp.ne.s32.totalorder %s2106_s21, %s1733_s26  ;;  %p1735_p4 = pneg %p2112_p2 }
  0x27   : > { %s1738_s10 = scalar_lea.hbm %s2629_s1, 512  ;;  %p1739_p7 = scmp.lt.u32.totalorder %s2106_s21, %s2629_s1 }
  0x28   : > { %p1736_p5 = pnand %p1735_p4, %p1734_p3  ;;  %p1740_p8 = scmp.lt.u32.totalorder %s1738_s10, %s1733_s26 }
  0x29   : > { %p1742_p11 = scmp.lt.u32.totalorder %s1733_s26, %s2106_s21 }
  0x2a   : > { %p1737_p6 = pneg %p1736_p5  ;;  %p1741_p10 = por %p1740_p8, %p1739_p7 }
  0x2c   : > { %p1743_p13 = por %p1742_p11, %p1741_p10 }
  0x2e   : > { %p1744_p12 = pnand %p1743_p13, %p1737_p6 }
  0x30   : > { %1747 = shalt.err (!%p1744_p12)
}
  0x31   : > { %s1748_s20 = scalar_lea.vmem %s2116_s23, 256  ;;  %s1984_s22 = smov [#allocation4]  }
  0x32   : > { %p1749_p3 = scmp.ne.s32.totalorder %s2116_s23, %s1748_s20  ;;  %s1753_s27 = sshll.u32 %s1984_s22, 4  ;;  %s1754_s27 = int_to_ptr.vmem [resolvable:$false] %s1753_s27 }
  0x33   : > { %s1755_s9 = scalar_lea.vmem %s1754_s27, 512  ;;  %p1756_p0 = scmp.lt.s32.totalorder %s2116_s23, %s1754_s27 }
  0x34   : > { %p1751_p5 = pnand %p1749_p3, %p1735_p4  ;;  %p1757_p7 = scmp.lt.s32.totalorder %s1755_s9, %s1748_s20 }
  0x36   : > { %p1752_p1 = pneg %p1751_p5  ;;  %p1758_p8 = por %p1757_p7, %p1756_p0 }
  0x38   : > { %p1759_p10 = pnand %p1758_p8, %p1752_p1 }
  0x3a   : > { %1762 = shalt.err (!%p1759_p10)
}
  0x3b   : > { %s1985_s26 = smov 128   ;;  %s1986_s10 = smov 8  }
  0x3c   : > { %1482 = dma.hbm_to_vmem [thread:$0]  (!%p2112_p2), %s2106_s21, 256, %s2116_s23, %s181_s25, %s1985_s26, %s1985_s26, %s1986_s10  }
  0x3d   : > { %p1409_p12 = scmp.ge.s32.totalorder %s1953_s6, 1  ;;  %p220_p0 = scmp.lt.s32.totalorder %s1953_s6, 3 }
  0x3e   : > { %s2160_s22 = scalar_lea.hbm %s2630_s2, %s1432_s17  ;;  %s205_s27 = scalar_lea.vmem [#allocation7], %s1403_s18 }
  0x3f   : > { %p2151_p1 = pnand %p1409_p12, %p220_p0  ;;  %s212_s9 = sshll.u32 %s205_s27, 4  ;;  %s2164_s9 = int_to_ptr.vmem [resolvable:$true] %s212_s9 }
  0x40   : > { %s202_s21 = scalar_lea.sflag [#allocation8], %s2097_s16  ;;  %s1763_s23 = scalar_lea.hbm %s2160_s22, 256 }
  0x41   : > { %p1764_p6 = scmp.ne.s32.totalorder %s2160_s22, %s1763_s23  ;;  %s1768_s17 = scalar_lea.hbm %s2630_s2, 512 }
  0x42   : > { %p1769_p3 = scmp.lt.u32.totalorder %s2160_s22, %s2630_s2  ;;  %p1770_p5 = scmp.lt.u32.totalorder %s1768_s17, %s1763_s23 }
  0x43   : > { %p1766_p11 = pnand %p1764_p6, %p1735_p4  ;;  %p1772_p8 = scmp.lt.u32.totalorder %s1763_s23, %s2160_s22 }
  0x44   : > { %p1771_p7 = por %p1770_p5, %p1769_p3 }
  0x45   : > { %p1767_p13 = pneg %p1766_p11 }
  0x46   : > { %p1773_p10 = por %p1772_p8, %p1771_p7 }
  0x48   : > { %p1774_p12 = pnand %p1773_p10, %p1767_p13 }
  0x4a   : > { %1777 = shalt.err (!%p1774_p12)
}
  0x4b   : > { %s1778_s18 = scalar_lea.vmem %s2164_s9, 256  ;;  %s1987_s27 = smov [#allocation7]  }
  0x4c   : > { %p1779_p0 = scmp.ne.s32.totalorder %s2164_s9, %s1778_s18  ;;  %s1783_s25 = sshll.u32 %s1987_s27, 4  ;;  %s1784_s25 = int_to_ptr.vmem [resolvable:$false] %s1783_s25 }
  0x4d   : > { %s1785_s7 = scalar_lea.vmem %s1784_s25, 512  ;;  %p1786_p9 = scmp.lt.s32.totalorder %s2164_s9, %s1784_s25 }
  0x4e   : > { %p1781_p6 = pnand %p1779_p0, %p1735_p4  ;;  %p1787_p3 = scmp.lt.s32.totalorder %s1785_s7, %s1778_s18 }
  0x50   : > { %p1782_p11 = pneg %p1781_p6  ;;  %p1788_p5 = por %p1787_p3, %p1786_p9 }
  0x52   : > { %p1789_p7 = pnand %p1788_p5, %p1782_p11 }
  0x54   : > { %1792 = shalt.err (!%p1789_p7)
}
  0x55   : > { %1485 = dma.hbm_to_vmem [thread:$0]  (!%p2112_p2), %s2160_s22, 256, %s2164_s9, %s202_s21, %s1985_s26, %s1985_s26, %s1986_s10  }
  0x56   : > { %224 = sbr.rel (%p2151_p1) target bundleno = 4184 (0x1058), region = 28  ;;  %s2198_s23 = sand.u32 (!%p2151_p1), 1, %s1945_s29  }
  0x57   : > { %s2201_s19 = sshll.u32 (!%p2151_p1), %s2198_s23, 4  ;;  %s227_s24 = scalar_lea.sflag (!%p2151_p1), [#allocation5], %s2198_s23 }
  0x58   : > { %s230_s17 = scalar_lea.vmem (!%p2151_p1), [#allocation4], %s2201_s19  ;;  %p2643_p9 = scmp.ne.s32.totalorder (!%p2151_p1), %s2638_s13, 0 }
  0x5d   : > { %1924 = dma.done.wait (%p2643_p9), %s227_s24, 256  }
  0x5e   : > { %1926 = vsyncadd (%p2643_p9), %s227_s24, 4294967040  ;;  %s236_s16 = scalar_lea.sflag [#allocation8], %s2198_s23  ;;  %s239_s26 = scalar_lea.vmem [#allocation7], %s2201_s19 }
  0x5f   : > { %1928 = dma.done.wait (%p2643_p9), %s236_s16, 256  }
  0x60   : > { %1930 = vsyncadd (%p2643_p9), %s236_s16, 4294967040  ;;  %s2216_s10 = sld [smem:[#allocation3 + %s2057_s0]]  ;;  %v2218_v0 = vld [vmem:[%s230_s17] sm:$0xff]  ;;  %vm316_vm0 = vcmask 130048   ;;  %v2220_v1 = vld [vmem:[%s230_s17 + $0x8] sm:$0xff]  ;;  %v1988_v21 = vmov 0  }
  0x61   : > { %v2222_v2 = vld [vmem:[%s239_s26] sm:$0xff]  ;;  %284 = vxpose.xlu0.b32.start [1/2] (short) (narrow) %v2218_v0, 16  ;;  %v398_v3 = vmul.f32 %v2218_v0, %v2218_v0  ;;  %v399_v4 = vmul.f32 %v2220_v1, %v2220_v1  ;;  %v2229_v5 = vld [vmem:[%s239_s26 + $0x8] sm:$0xff]  ;;  %s2249_s13 = scalar_lea.vmem [#allocation9], %s2201_s19  ;;  %s2252_s12 = scalar_lea.vmem [#allocation10], %s2201_s19  ;;  %v2257_v48 = vmov 0.0  }
  0x62   : > { %v409_v6 = vmul.f32 %v2222_v2, %v2222_v2  ;;  %v1459_v7 = vpack.c.bf16 %v2229_v5, %v2222_v2  ;;  %v410_v8 = vmul.f32 %v2229_v5, %v2229_v5  ;;  %s2255_s22 = scalar_lea.vmem [#allocation12], %s2201_s19  ;;  %v2259_v49 = vmov 0.0   ;;  %s2261_s9 = smov 0  }
  0x63   : > { %v400_v9 = vsel %vm316_vm0, %v398_v3, 0.0  ;;  %v401_v10 = vsel %vm316_vm0, %v399_v4, 0.0 }
  0x64   : > { %v411_v11 = vsel %vm316_vm0, %v409_v6, 0.0  ;;  %v402_v12 = vadd.f32 %v401_v10, %v400_v9  ;;  %1460 = vmatprep.subr.bf16.mxu0 %v1459_v7  ;;  %v412_v13 = vsel %vm316_vm0, %v410_v8, 0.0 }
  0x65   : > { %285 = vxpose.xlu0.b32.end [2/2] (short) (narrow) %v2220_v1, 16  ;;  %v413_v14 = vadd.f32 %v412_v13, %v411_v11  ;;  %1462 = vmatpush3.bf16.msra.mxu0 %v1459_v7 }
  0x66   : > { %v403_v15 = vrot.slane %v402_v12, 4 }
  0x67   : > { %v414_v26 = vrot.slane %v413_v14, 4 }
  0x68   : > { %v404_v16 = vadd.f32 %v403_v15, %v402_v12 }
  0x69   : > { %v415_v27 = vadd.f32 %v414_v26, %v413_v14 }
  0x6a   : > { %v405_v17 = vrot.slane %v404_v16, 2 }
  0x6b   : > { %v416_v28 = vrot.slane %v415_v27, 2 }
  0x6c   : > { %v406_v18 = vadd.f32 %v405_v17, %v404_v16 }
  0x6d   : > { %v417_v29 = vadd.f32 %v416_v28, %v415_v27 }
  0x6e   : > { %v407_v19 = vrot.slane %v406_v18, 1 }
  0x6f   : > { %v418_v30 = vrot.slane %v417_v29, 1 }
  0x70   : > { %v408_v20 = vadd.f32 %v407_v19, %v406_v18 }
  0x71   : > { %v419_v32 = vadd.f32 %v418_v30, %v417_v29 }
  0x72   : > { %420 = vxpose.xlu1.b32.start.end [1/1] (short) (narrow) %v408_v20, 16 }
  0x8e   : > { %1594 = vset.pattern.permute.xlu0 %v1988_v21 }
  0x90   : > { %1593 = vset.pattern.permute.xlu1 %v1988_v21 }
  0xe1   : > { %v300_v22 = vpop.trf.xlu0 }
  0xe2   : > { %1449 = vmatprep.mubr.msk.f32.mxu0 %vm316_vm0, %v300_v22 }
  0xe5   : > { %v301_v23 = vpop.trf.xlu0 }
  0xe6   : > { %1450 = vmatmul.mubr.msk.f32.vlgmr.msra.gmra.mrb[0].mxu0 %vm316_vm0, %v301_v23 }
  0xf2   : > { %v436_v24 = vpop.trf.xlu1 }
  0xf3   : > { %454 = vperm.xlu1 %1593, %v436_v24  }
  0xf6   : > { %v437_v25 = vpop.trf.xlu1 }
  0xf7   : > { %459 = vperm.xlu0 %1594, %v437_v25  }
 0x172   : > { %v455_v33 = vpop.permute.xlu1 %454 }
 0x173   : > { %v462_v38 = vadd.f32 %v455_v33, %v419_v32 }
 0x176   : > { %v460_v31 = vpop.permute.xlu0 %459 }
 0x177   : > { %v463_v34 = vadd.f32 %v460_v31, %v419_v32 }
 0x1b9   : > { %v1451_v35 = vpop.f32.mrb[0].mxu0 }
 0x1ba   : > { %v465_v36 = vmul.f32 2.0, %v1451_v35  ;;  %v389_v37 = vpop.f32.mrb[1].mxu0 }
 0x1bb   : > { %v464_v39 = vmul.f32 2.0, %v389_v37 }
 0x1bc   : > { %v467_v40 = vsub.f32 %v463_v34, %v465_v36 }
 0x1bd   : > { %v466_v41 = vsub.f32 %v462_v38, %v464_v39 }
 0x1be   : > { %v469_v42 = vmax.f32 %v467_v40, 0.0 }
 0x1bf   : > { %v468_v43 = vmax.f32 %v466_v41, 0.0 }
 0x1c0   : > { %v471_v44 = vsub.f32 0.0, %v469_v42 }
 0x1c1   : > { %v470_v45 = vsub.f32 0.0, %v468_v43 }
 0x1c2   : > { %v2244_v46 = vmul.f32 100.0, %v471_v44 }
 0x1c3   : > { %v2246_v47 = vmul.f32 100.0, %v470_v45 }
 0x1c4 LB: >> { %v484_v51 = vadd.f32 %v1957_v48, %v2244_v46  ;;  %s479_s9 = sadd.s32 1, %s1965_s9   ;;  %s1965_s9 = sphi %s2261_s9, %s479_s9   ;;  %v1961_v49 = vphi %v2259_v49, %v2645_v49   ;;  %v1957_v48 = vphi %v2257_v48, %v2644_v48  }
 0x1c5   : >> { %v483_v50 = vadd.f32 %v1961_v49, %v2246_v47  ;;  %p476_p2 = scmp.ge.s32.totalorder %s479_s9, 5  }
 0x1c6   : >> { %v486_v53 = vsel %vm316_vm0, %v484_v51, -inf  ;;  %s2293_s21 = smov (%p476_p2), 0  }
 0x1c7   : >> { %v485_v52 = vsel %vm316_vm0, %v483_v50, -inf }
 0x1c8   : >> { %v487_v54 = vmax.f32 %v485_v52, %v486_v53 }
 0x1ca   : >> { %v488_v55 = vrot.slane %v487_v54, 4 }
 0x1cc   : >> { %v489_v56 = vmax.f32 %v487_v54, %v488_v55 }
 0x1ce   : >> { %v490_v57 = vrot.slane %v489_v56, 2 }
 0x1d0   : >> { %v491_v58 = vmax.f32 %v489_v56, %v490_v57 }
 0x1d2   : >> { %v492_v59 = vrot.slane %v491_v58, 1 }
 0x1d4   : >> { %v493_v60 = vmax.f32 %v491_v58, %v492_v59 }
 0x1d6   : >> { %v494_v61 = vsub.f32 %v483_v50, %v493_v60  ;;  %v495_v62 = vsub.f32 %v484_v51, %v493_v60 }
 0x1d8   : >> { %v496_v63 = vmul.f32 1.442695, %v494_v61  ;;  %v498_v3 = vmul.f32 1.442695, %v495_v62 }
 0x1da   : >> { %1595 = vpow2.f32 %v496_v63 }
 0x1db   : >> { %1597 = vpow2.f32 %v498_v3 }
 0x1e4   : >> { %v1596_v4 = vpop.eup %1595 }
 0x1e5   : >> { %v1598_v6 = vpop.eup %1597  ;;  %v500_v7 = vsel %vm316_vm0, %v1596_v4, 0.0 }
 0x1e6   : >> { %v501_v8 = vsel %vm316_vm0, %v1598_v6, 0.0 }
 0x1e7   : >> { %v502_v9 = vadd.f32 %v501_v8, %v500_v7 }
 0x1e9   : >> { %v503_v10 = vrot.slane %v502_v9, 4 }
 0x1eb   : >> { %v504_v11 = vadd.f32 %v503_v10, %v502_v9 }
 0x1ed   : >> { %v505_v12 = vrot.slane %v504_v11, 2 }
 0x1ef   : >> { %v506_v13 = vadd.f32 %v505_v12, %v504_v11 }
 0x1f1   : >> { %v507_v14 = vrot.slane %v506_v13, 1 }
 0x1f3   : >> { %v508_v15 = vadd.f32 %v507_v14, %v506_v13 }
 0x1f5   : >> { %1599 = vlog2.f32 %v508_v15 }
 0x1ff   : >> { %v1600_v16 = vpop.eup %1599 }
 0x200   : >> { %v510_v17 = vmul.f32 0.6931472, %v1600_v16 }
 0x202   : >> { %v511_v18 = vadd.f32 %v510_v17, %v493_v60 }
 0x204   : >> { %v512_v19 = vsub.f32 -2.7725887, %v511_v18  }
 0x206   : >> { %v513_v20 = vadd.f32 %v512_v19, %v2246_v47  ;;  %v514_v21 = vadd.f32 %v512_v19, %v2244_v46 }
 0x208   : >> { %v515_v22 = vsel %vm316_vm0, %v513_v20, -inf  ;;  %v518_v23 = vsel %vm316_vm0, %v514_v21, -inf }
 0x209   : >> { %516 = vmax.xlane.f32.xlu0 %v515_v22 }
 0x20d   : >> { %519 = vmax.xlane.f32.xlu0 %v518_v23 }
 0x296   : >> { %v517_v24 = vpop.xlane.xlu0 %516 }
 0x297   : >> { %v521_v25 = vsub.f32 %v513_v20, %v517_v24 }
 0x299   : >> { %v523_v26 = vmul.f32 1.442695, %v521_v25 }
 0x29a   : >> { %v520_v27 = vpop.xlane.xlu0 %519 }
 0x29b   : >> { %v522_v28 = vsub.f32 %v514_v21, %v520_v27  ;;  %1601 = vpow2.f32 %v523_v26 }
 0x29d   : >> { %v525_v29 = vmul.f32 1.442695, %v522_v28 }
 0x29f   : >> { %1603 = vpow2.f32 %v525_v29 }
 0x2a5   : >> { %v1602_v30 = vpop.eup %1601 }
 0x2a6   : >> { %v527_v31 = vsel %vm316_vm0, %v1602_v30, 0.0 }
 0x2a7   : >> { %528 = vadd.xlane.f32.xlu1 %v527_v31 }
 0x2a9   : >> { %v1604_v32 = vpop.eup %1603 }
 0x2aa   : >> { %v530_v33 = vsel %vm316_vm0, %v1604_v32, 0.0 }
 0x2ab   : >> { %531 = vadd.xlane.f32.xlu1 %v530_v33 }
 0x334   : >> { %v529_v34 = vpop.xlane.xlu1 %528 }
 0x335   : >> { %1605 = vlog2.f32 %v529_v34 }
 0x338   : >> { %v532_v35 = vpop.xlane.xlu1 %531 }
 0x339   : >> { %1607 = vlog2.f32 %v532_v35 }
 0x33f   : >> { %v1606_v36 = vpop.eup %1605 }
 0x340   : >> { %v534_v37 = vmul.f32 0.6931472, %v1606_v36 }
 0x342   : >> { %v537_v38 = vadd.f32 %v534_v37, %v517_v24 }
 0x343   : >> { %v1608_v39 = vpop.eup %1607 }
 0x344   : >> { %v539_v40 = vsub.f32 -2.7725887, %v537_v38   ;;  %v536_v41 = vmul.f32 0.6931472, %v1608_v39  ;;  %478 = sbr.rel (!%p476_p2) target bundleno = 452 (0x1c4), region = 132 }
 0x346   : >> { %v538_v42 = vadd.f32 %v536_v41, %v520_v27  ;;  %v2645_v49 = vmov %v539_v40 }
 0x348   : >> { %v540_v43 = vsub.f32 -2.7725887, %v538_v42  }
 0x34a   : >> { %v2644_v48 = vmov %v540_v43 }
 0x34b LB: >> { %v550_v44 = vadd.f32 %v1977_v40, %v2246_v47  ;;  %v551_v45 = vadd.f32 %v1973_v43, %v2244_v46  ;;  %s546_s21 = sadd.s32 1, %s1981_s21   ;;  %s1981_s21 = sphi %s2293_s21, %s546_s21   ;;  %v1977_v40 = vphi %v539_v40, %v2651_v40   ;;  %v1973_v43 = vphi %v540_v43, %v2650_v43   ;;  %v1969_v19 = vphi %v512_v19, %v2649_v19  }
 0x34c   : >> { %p543_p4 = scmp.ge.s32.totalorder %s546_s21, 9  }
 0x34d   : >> { %v552_v48 = vadd.f32 %v1969_v19, %v550_v44  ;;  %v553_v49 = vadd.f32 %v1969_v19, %v551_v45  ;;  %1456 = vmatprep.mubr.msk.f32.mxu1 (%p543_p4), %vm316_vm0, %v2218_v0  ;;  %vm1464_vm1 = vmpackc.low (%p543_p4), %vm316_vm0, %vm316_vm0  ;;  %s1143_s20 = ssub.f32 (%p543_p4), 1.0, %s2216_s10  ;;  %s1434_s27 = sshll.u32 (%p543_p4), %s2057_s0, 8 }
 0x34e   : > { %s1183_s25 = sshll.u32 (%p543_p4), %s2249_s13, 4  ;;  %s1199_s7 = sshll.u32 (%p543_p4), %s2252_s12, 4  ;;  %s2501_s25 = int_to_ptr.vmem [resolvable:$true] %s1183_s25  ;;  %s2511_s7 = int_to_ptr.vmem [resolvable:$true] %s1199_s7 }
 0x34f   : >> { %v554_v50 = vmul.f32 1.442695, %v552_v48  ;;  %v556_v51 = vmul.f32 1.442695, %v553_v49  ;;  %s1215_s19 = sshll.u32 (%p543_p4), %s2255_s22, 4  ;;  %s2499_s16 = scalar_lea.hbm (%p543_p4), %s2631_s3, %s1434_s27  ;;  %s2521_s19 = int_to_ptr.vmem [resolvable:$true] %s1215_s19 }
 0x350   : > { %s2509_s9 = scalar_lea.hbm (%p543_p4), %s2632_s4, %s1434_s27  ;;  %s1160_s24 = scalar_lea.sflag (%p543_p4), [#allocation6], %s2198_s23 }
 0x351   : >> { %1609 = vpow2.f32 %v554_v50  ;;  %s1793_s17 = scalar_lea.vmem (%p543_p4), %s2501_s25, 256  ;;  %p2652_p13 = scmp.ne.s32.totalorder (%p543_p4), %s2639_s14, 0 }
 0x352   : >> { %1611 = vpow2.f32 %v556_v51  ;;  %p1794_p1 = scmp.ne.s32.totalorder (%p543_p4), %s2501_s25, %s1793_s17  ;;  %s1989_s26 = smov (%p543_p4), [#allocation9]  }
 0x354   : > { %p1795_p8 = pnand (%p543_p4), %p1794_p1, %p2652_p13 }
 0x356   : > { %p1796_p10 = pneg (%p543_p4), %p1795_p8 }
 0x35b   : >> { %v2313_v52 = vpop.eup %1609 }
 0x35c   : >> { %v2315_v53 = vpop.eup %1611  ;;  %v558_v54 = vsel %vm316_vm0, %v2313_v52, 0.0 }
 0x35d   : >> { %v559_v55 = vsel %vm316_vm0, %v2315_v53, 0.0 }
 0x35e   : >> { %v560_v56 = vadd.f32 %v559_v55, %v558_v54 }
 0x360   : >> { %v561_v57 = vrot.slane %v560_v56, 4 }
 0x362   : >> { %v562_v58 = vadd.f32 %v561_v57, %v560_v56 }
 0x364   : >> { %v563_v59 = vrot.slane %v562_v58, 2 }
 0x366   : >> { %v564_v60 = vadd.f32 %v563_v59, %v562_v58 }
 0x368   : >> { %v565_v61 = vrot.slane %v564_v60, 1 }
 0x36a   : >> { %v566_v62 = vadd.f32 %v565_v61, %v564_v60 }
 0x36c   : >> { %v567_v63 = vmax.f32 %v566_v62, 1e-30 }
 0x36e   : >> { %v568_v3 = vmin.f32 %v567_v63, 1e+30 }
 0x370   : >> { %1613 = vrcp.f32 %v568_v3 }
 0x37a   : >> { %v1614_v4 = vpop.eup %1613 }
 0x37b   : >> { %v570_v6 = vmul.f32 0.0625, %v1614_v4 }
 0x37d   : >> { %v571_v7 = vmul.f32 %v2313_v52, %v570_v6  ;;  %v572_v8 = vmul.f32 %v2315_v53, %v570_v6 }
 0x37f   : >> { %v573_v9 = vsel %vm316_vm0, %v571_v7, 0.0  ;;  %v576_v10 = vsel %vm316_vm0, %v572_v8, 0.0 }
 0x380   : >> { %574 = vadd.xlane.f32.xlu0 %v573_v9 }
 0x384   : >> { %577 = vadd.xlane.f32.xlu0 %v576_v10 }
 0x40d   : >> { %v575_v11 = vpop.xlane.xlu0 %574 }
 0x40e   : >> { %v579_v12 = vmax.f32 %v575_v11, 1e-30 }
 0x410   : >> { %v581_v13 = vmin.f32 %v579_v12, 1e+30 }
 0x411   : >> { %v578_v14 = vpop.xlane.xlu0 %577 }
 0x412   : >> { %1615 = vrcp.f32 %v581_v13  ;;  %v580_v15 = vmax.f32 %v578_v14, 1e-30 }
 0x414   : >> { %v582_v16 = vmin.f32 %v580_v15, 1e+30 }
 0x416   : >> { %1617 = vrcp.f32 %v582_v16 }
 0x41c   : >> { %v1616_v17 = vpop.eup %1615 }
 0x41d   : >> { %v584_v18 = vmul.f32 0.0625, %v1616_v17 }
 0x41f   : >> { %v587_v21 = vmul.f32 %v2313_v52, %v584_v18 }
 0x420   : >> { %v1618_v20 = vpop.eup %1617 }
 0x421   : >> { %v586_v22 = vmul.f32 0.0625, %v1618_v20  ;;  %v589_v24 = vsel %vm316_vm0, %v587_v21, 0.0 }
 0x423   : >> { %v588_v23 = vmul.f32 %v2315_v53, %v586_v22 }
 0x425   : >> { %v590_v25 = vsel %vm316_vm0, %v588_v23, 0.0 }
 0x426   : >> { %v591_v26 = vadd.f32 %v590_v25, %v589_v24 }
 0x428   : >> { %v592_v27 = vrot.slane %v591_v26, 4 }
 0x42a   : >> { %v593_v28 = vadd.f32 %v592_v27, %v591_v26 }
 0x42c   : >> { %v594_v29 = vrot.slane %v593_v28, 2 }
 0x42e   : >> { %v595_v30 = vadd.f32 %v594_v29, %v593_v28 }
 0x430   : >> { %v596_v31 = vrot.slane %v595_v30, 1 }
 0x432   : >> { %v597_v32 = vadd.f32 %v596_v31, %v595_v30 }
 0x434   : >> { %v598_v33 = vmax.f32 %v597_v32, 1e-30 }
 0x436   : >> { %v599_v34 = vmin.f32 %v598_v33, 1e+30 }
 0x438   : >> { %1619 = vrcp.f32 %v599_v34 }
 0x442   : >> { %v1620_v35 = vpop.eup %1619 }
 0x443   : >> { %v601_v36 = vmul.f32 0.0625, %v1620_v35 }
 0x445   : >> { %v602_v37 = vmul.f32 %v2313_v52, %v601_v36  ;;  %v603_v39 = vmul.f32 %v2315_v53, %v601_v36 }
 0x447   : >> { %v604_v38 = vsel %vm316_vm0, %v602_v37, 0.0  ;;  %v607_v41 = vsel %vm316_vm0, %v603_v39, 0.0 }
 0x448   : >> { %605 = vadd.xlane.f32.xlu1 %v604_v38 }
 0x44c   : >> { %608 = vadd.xlane.f32.xlu1 %v607_v41 }
 0x4d5   : >> { %v606_v42 = vpop.xlane.xlu1 %605 }
 0x4d6   : >> { %v610_v44 = vmax.f32 %v606_v42, 1e-30 }
 0x4d8   : >> { %v612_v45 = vmin.f32 %v610_v44, 1e+30 }
 0x4d9   : >> { %v609_v48 = vpop.xlane.xlu1 %608 }
 0x4da   : >> { %1621 = vrcp.f32 %v612_v45  ;;  %v611_v49 = vmax.f32 %v609_v48, 1e-30 }
 0x4dc   : >> { %v613_v50 = vmin.f32 %v611_v49, 1e+30 }
 0x4de   : >> { %1623 = vrcp.f32 %v613_v50 }
 0x4e4   : >> { %v1622_v51 = vpop.eup %1621 }
 0x4e5   : >> { %v615_v54 = vmul.f32 0.0625, %v1622_v51 }
 0x4e7   : >> { %v618_v56 = vmul.f32 %v2313_v52, %v615_v54 }
 0x4e8   : >> { %v1624_v55 = vpop.eup %1623 }
 0x4e9   : >> { %v617_v57 = vmul.f32 0.0625, %v1624_v55  ;;  %v620_v59 = vsel %vm316_vm0, %v618_v56, 0.0 }
 0x4eb   : >> { %v619_v58 = vmul.f32 %v2315_v53, %v617_v57 }
 0x4ed   : >> { %v621_v60 = vsel %vm316_vm0, %v619_v58, 0.0 }
 0x4ee   : >> { %v622_v61 = vadd.f32 %v621_v60, %v620_v59 }
 0x4f0   : >> { %v623_v62 = vrot.slane %v622_v61, 4 }
 0x4f2   : >> { %v624_v63 = vadd.f32 %v623_v62, %v622_v61 }
 0x4f4   : >> { %v625_v3 = vrot.slane %v624_v63, 2 }
 0x4f6   : >> { %v626_v4 = vadd.f32 %v625_v3, %v624_v63 }
 0x4f8   : >> { %v627_v6 = vrot.slane %v626_v4, 1 }
 0x4fa   : >> { %v628_v7 = vadd.f32 %v627_v6, %v626_v4 }
 0x4fc   : >> { %v629_v8 = vmax.f32 %v628_v7, 1e-30 }
 0x4fe   : >> { %v630_v9 = vmin.f32 %v629_v8, 1e+30 }
 0x500   : >> { %1625 = vrcp.f32 %v630_v9 }
 0x50a   : >> { %v1626_v10 = vpop.eup %1625 }
 0x50b   : >> { %v632_v11 = vmul.f32 0.0625, %v1626_v10 }
 0x50d   : >> { %v634_v12 = vmul.f32 %v2315_v53, %v632_v11  ;;  %v633_v13 = vmul.f32 %v2313_v52, %v632_v11 }
 0x50f   : >> { %v638_v14 = vsel %vm316_vm0, %v634_v12, 0.0  ;;  %v635_v15 = vsel %vm316_vm0, %v633_v13, 0.0 }
 0x510   : >> { %639 = vadd.xlane.f32.xlu1 %v638_v14  ;;  %636 = vadd.xlane.f32.xlu0 %v635_v15 }
 0x59d   : >> { %v640_v16 = vpop.xlane.xlu1 %639  ;;  %v637_v17 = vpop.xlane.xlu0 %636 }
 0x59e   : >> { %v642_v18 = vmax.f32 %v640_v16, 1e-30  ;;  %v641_v20 = vmax.f32 %v637_v17, 1e-30 }
 0x5a0   : >> { %v644_v21 = vmin.f32 %v642_v18, 1e+30  ;;  %v643_v22 = vmin.f32 %v641_v20, 1e+30 }
 0x5a2   : >> { %1627 = vrcp.f32 %v644_v21 }
 0x5a3   : >> { %1629 = vrcp.f32 %v643_v22 }
 0x5ac   : >> { %v1628_v23 = vpop.eup %1627 }
 0x5ad   : >> { %v1630_v24 = vpop.eup %1629  ;;  %v648_v25 = vmul.f32 0.0625, %v1628_v23 }
 0x5ae   : >> { %v646_v26 = vmul.f32 0.0625, %v1630_v24 }
 0x5af   : >> { %v650_v27 = vmul.f32 %v2315_v53, %v648_v25 }
 0x5b0   : >> { %v649_v28 = vmul.f32 %v2313_v52, %v646_v26 }
 0x5b1   : >> { %v652_v29 = vsel %vm316_vm0, %v650_v27, 0.0 }
 0x5b2   : >> { %v651_v30 = vsel %vm316_vm0, %v649_v28, 0.0 }
 0x5b3   : >> { %v653_v31 = vadd.f32 %v652_v29, %v651_v30 }
 0x5b5   : >> { %v654_v32 = vrot.slane %v653_v31, 4 }
 0x5b7   : >> { %v655_v33 = vadd.f32 %v654_v32, %v653_v31 }
 0x5b9   : >> { %v656_v34 = vrot.slane %v655_v33, 2 }
 0x5bb   : >> { %v657_v35 = vadd.f32 %v656_v34, %v655_v33 }
 0x5bd   : >> { %v658_v36 = vrot.slane %v657_v35, 1 }
 0x5bf   : >> { %v659_v37 = vadd.f32 %v658_v36, %v657_v35 }
 0x5c1   : >> { %v660_v38 = vmax.f32 %v659_v37, 1e-30 }
 0x5c3   : >> { %v661_v39 = vmin.f32 %v660_v38, 1e+30 }
 0x5c5   : >> { %1631 = vrcp.f32 %v661_v39 }
 0x5cf   : >> { %v1632_v41 = vpop.eup %1631 }
 0x5d0   : >> { %v663_v42 = vmul.f32 0.0625, %v1632_v41 }
 0x5d2   : >> { %v665_v44 = vmul.f32 %v2315_v53, %v663_v42  ;;  %v664_v45 = vmul.f32 %v2313_v52, %v663_v42 }
 0x5d4   : >> { %v669_v48 = vsel %vm316_vm0, %v665_v44, 0.0  ;;  %v666_v49 = vsel %vm316_vm0, %v664_v45, 0.0 }
 0x5d5   : >> { %670 = vadd.xlane.f32.xlu1 %v669_v48  ;;  %667 = vadd.xlane.f32.xlu0 %v666_v49 }
 0x662   : >> { %v671_v50 = vpop.xlane.xlu1 %670  ;;  %v668_v51 = vpop.xlane.xlu0 %667 }
 0x663   : >> { %v673_v54 = vmax.f32 %v671_v50, 1e-30  ;;  %v672_v55 = vmax.f32 %v668_v51, 1e-30 }
 0x665   : >> { %v675_v56 = vmin.f32 %v673_v54, 1e+30  ;;  %v674_v57 = vmin.f32 %v672_v55, 1e+30 }
 0x667   : >> { %1633 = vrcp.f32 %v675_v56 }
 0x668   : >> { %1635 = vrcp.f32 %v674_v57 }
 0x671   : >> { %v1634_v58 = vpop.eup %1633 }
 0x672   : >> { %v1636_v59 = vpop.eup %1635  ;;  %v679_v60 = vmul.f32 0.0625, %v1634_v58 }
 0x673   : >> { %v677_v61 = vmul.f32 0.0625, %v1636_v59 }
 0x674   : >> { %v681_v62 = vmul.f32 %v2315_v53, %v679_v60 }
 0x675   : >> { %v680_v63 = vmul.f32 %v2313_v52, %v677_v61 }
 0x676   : >> { %v683_v3 = vsel %vm316_vm0, %v681_v62, 0.0 }
 0x677   : >> { %v682_v4 = vsel %vm316_vm0, %v680_v63, 0.0 }
 0x678   : >> { %v684_v6 = vadd.f32 %v683_v3, %v682_v4 }
 0x67a   : >> { %v685_v7 = vrot.slane %v684_v6, 4 }
 0x67c   : >> { %v686_v8 = vadd.f32 %v685_v7, %v684_v6 }
 0x67e   : >> { %v687_v9 = vrot.slane %v686_v8, 2 }
 0x680   : >> { %v688_v10 = vadd.f32 %v687_v9, %v686_v8 }
 0x682   : >> { %v689_v11 = vrot.slane %v688_v10, 1 }
 0x684   : >> { %v690_v12 = vadd.f32 %v689_v11, %v688_v10 }
 0x686   : >> { %v691_v13 = vmax.f32 %v690_v12, 1e-30 }
 0x688   : >> { %v692_v14 = vmin.f32 %v691_v13, 1e+30 }
 0x68a   : >> { %1637 = vrcp.f32 %v692_v14 }
 0x694   : >> { %v1638_v15 = vpop.eup %1637 }
 0x695   : >> { %v694_v16 = vmul.f32 0.0625, %v1638_v15 }
 0x697   : >> { %v696_v17 = vmul.f32 %v2315_v53, %v694_v16  ;;  %v695_v18 = vmul.f32 %v2313_v52, %v694_v16 }
 0x699   : >> { %v700_v20 = vsel %vm316_vm0, %v696_v17, 0.0  ;;  %v697_v21 = vsel %vm316_vm0, %v695_v18, 0.0 }
 0x69a   : >> { %701 = vadd.xlane.f32.xlu1 %v700_v20  ;;  %698 = vadd.xlane.f32.xlu0 %v697_v21 }
 0x727   : >> { %v702_v22 = vpop.xlane.xlu1 %701  ;;  %v699_v23 = vpop.xlane.xlu0 %698 }
 0x728   : >> { %v704_v24 = vmax.f32 %v702_v22, 1e-30  ;;  %v703_v25 = vmax.f32 %v699_v23, 1e-30 }
 0x72a   : >> { %v706_v26 = vmin.f32 %v704_v24, 1e+30  ;;  %v705_v27 = vmin.f32 %v703_v25, 1e+30 }
 0x72c   : >> { %1639 = vrcp.f32 %v706_v26 }
 0x72d   : >> { %1641 = vrcp.f32 %v705_v27 }
 0x736   : >> { %v1640_v28 = vpop.eup %1639 }
 0x737   : >> { %v1642_v29 = vpop.eup %1641  ;;  %v710_v30 = vmul.f32 0.0625, %v1640_v28 }
 0x738   : >> { %v708_v31 = vmul.f32 0.0625, %v1642_v29 }
 0x739   : >> { %v712_v32 = vmul.f32 %v2315_v53, %v710_v30 }
 0x73a   : >> { %v711_v33 = vmul.f32 %v2313_v52, %v708_v31 }
 0x73b   : >> { %v714_v34 = vsel %vm316_vm0, %v712_v32, 0.0 }
 0x73c   : >> { %v713_v35 = vsel %vm316_vm0, %v711_v33, 0.0 }
 0x73d   : >> { %v715_v36 = vadd.f32 %v714_v34, %v713_v35 }
 0x73f   : >> { %v716_v37 = vrot.slane %v715_v36, 4 }
 0x741   : >> { %v717_v38 = vadd.f32 %v716_v37, %v715_v36 }
 0x743   : >> { %v718_v39 = vrot.slane %v717_v38, 2 }
 0x745   : >> { %v719_v41 = vadd.f32 %v718_v39, %v717_v38 }
 0x747   : >> { %v720_v42 = vrot.slane %v719_v41, 1 }
 0x749   : >> { %v721_v44 = vadd.f32 %v720_v42, %v719_v41 }
 0x74b   : >> { %v722_v45 = vmax.f32 %v721_v44, 1e-30 }
 0x74d   : >> { %v723_v48 = vmin.f32 %v722_v45, 1e+30 }
 0x74f   : >> { %1643 = vrcp.f32 %v723_v48 }
 0x759   : >> { %v1644_v49 = vpop.eup %1643 }
 0x75a   : >> { %v725_v50 = vmul.f32 0.0625, %v1644_v49 }
 0x75c   : >> { %v727_v51 = vmul.f32 %v2315_v53, %v725_v50  ;;  %v726_v54 = vmul.f32 %v2313_v52, %v725_v50 }
 0x75e   : >> { %v731_v55 = vsel %vm316_vm0, %v727_v51, 0.0  ;;  %v728_v56 = vsel %vm316_vm0, %v726_v54, 0.0 }
 0x75f   : >> { %732 = vadd.xlane.f32.xlu1 %v731_v55  ;;  %729 = vadd.xlane.f32.xlu0 %v728_v56 }
 0x7ec   : >> { %v733_v57 = vpop.xlane.xlu1 %732  ;;  %v730_v58 = vpop.xlane.xlu0 %729 }
 0x7ed   : >> { %v735_v59 = vmax.f32 %v733_v57, 1e-30  ;;  %v734_v60 = vmax.f32 %v730_v58, 1e-30 }
 0x7ef   : >> { %v737_v61 = vmin.f32 %v735_v59, 1e+30  ;;  %v736_v62 = vmin.f32 %v734_v60, 1e+30 }
 0x7f1   : >> { %1645 = vrcp.f32 %v737_v61 }
 0x7f2   : >> { %1647 = vrcp.f32 %v736_v62 }
 0x7fb   : >> { %v1646_v63 = vpop.eup %1645 }
 0x7fc   : >> { %v1648_v3 = vpop.eup %1647  ;;  %v741_v4 = vmul.f32 0.0625, %v1646_v63 }
 0x7fd   : >> { %v739_v6 = vmul.f32 0.0625, %v1648_v3 }
 0x7fe   : >> { %v743_v7 = vmul.f32 %v2315_v53, %v741_v4 }
 0x7ff   : >> { %v742_v8 = vmul.f32 %v2313_v52, %v739_v6 }
 0x800   : >> { %v745_v9 = vsel %vm316_vm0, %v743_v7, 0.0 }
 0x801   : >> { %v744_v10 = vsel %vm316_vm0, %v742_v8, 0.0 }
 0x802   : >> { %v746_v11 = vadd.f32 %v745_v9, %v744_v10 }
 0x804   : >> { %v747_v12 = vrot.slane %v746_v11, 4 }
 0x806   : >> { %v748_v13 = vadd.f32 %v747_v12, %v746_v11 }
 0x808   : >> { %v749_v14 = vrot.slane %v748_v13, 2 }
 0x80a   : >> { %v750_v15 = vadd.f32 %v749_v14, %v748_v13 }
 0x80c   : >> { %v751_v16 = vrot.slane %v750_v15, 1 }
 0x80e   : >> { %v752_v17 = vadd.f32 %v751_v16, %v750_v15 }
 0x810   : >> { %v753_v18 = vmax.f32 %v752_v17, 1e-30 }
 0x812   : >> { %v754_v20 = vmin.f32 %v753_v18, 1e+30 }
 0x814   : >> { %1649 = vrcp.f32 %v754_v20 }
 0x81e   : >> { %v1650_v21 = vpop.eup %1649 }
 0x81f   : >> { %v756_v22 = vmul.f32 0.0625, %v1650_v21 }
 0x821   : >> { %v758_v23 = vmul.f32 %v2315_v53, %v756_v22  ;;  %v757_v24 = vmul.f32 %v2313_v52, %v756_v22 }
 0x823   : >> { %v762_v25 = vsel %vm316_vm0, %v758_v23, 0.0  ;;  %v759_v26 = vsel %vm316_vm0, %v757_v24, 0.0 }
 0x824   : >> { %763 = vadd.xlane.f32.xlu1 %v762_v25  ;;  %760 = vadd.xlane.f32.xlu0 %v759_v26 }
 0x8b1   : >> { %v764_v27 = vpop.xlane.xlu1 %763  ;;  %v761_v28 = vpop.xlane.xlu0 %760 }
 0x8b2   : >> { %v766_v29 = vmax.f32 %v764_v27, 1e-30  ;;  %v765_v30 = vmax.f32 %v761_v28, 1e-30 }
 0x8b4   : >> { %v768_v31 = vmin.f32 %v766_v29, 1e+30  ;;  %v767_v32 = vmin.f32 %v765_v30, 1e+30 }
 0x8b6   : >> { %1651 = vrcp.f32 %v768_v31 }
 0x8b7   : >> { %1653 = vrcp.f32 %v767_v32 }
 0x8c0   : >> { %v1652_v33 = vpop.eup %1651 }
 0x8c1   : >> { %v1654_v34 = vpop.eup %1653  ;;  %v772_v35 = vmul.f32 0.0625, %v1652_v33 }
 0x8c2   : >> { %v770_v36 = vmul.f32 0.0625, %v1654_v34 }
 0x8c3   : >> { %v774_v37 = vmul.f32 %v2315_v53, %v772_v35 }
 0x8c4   : >> { %v773_v38 = vmul.f32 %v2313_v52, %v770_v36 }
 0x8c5   : >> { %v776_v39 = vsel %vm316_vm0, %v774_v37, 0.0 }
 0x8c6   : >> { %v775_v41 = vsel %vm316_vm0, %v773_v38, 0.0 }
 0x8c7   : >> { %v777_v42 = vadd.f32 %v776_v39, %v775_v41 }
 0x8c9   : >> { %v778_v44 = vrot.slane %v777_v42, 4 }
 0x8cb   : >> { %v779_v45 = vadd.f32 %v778_v44, %v777_v42 }
 0x8cd   : >> { %v780_v48 = vrot.slane %v779_v45, 2 }
 0x8cf   : >> { %v781_v49 = vadd.f32 %v780_v48, %v779_v45 }
 0x8d1   : >> { %v782_v50 = vrot.slane %v781_v49, 1 }
 0x8d3   : >> { %v783_v51 = vadd.f32 %v782_v50, %v781_v49 }
 0x8d5   : >> { %v784_v54 = vmax.f32 %v783_v51, 1e-30 }
 0x8d7   : >> { %v785_v55 = vmin.f32 %v784_v54, 1e+30 }
 0x8d9   : >> { %1655 = vrcp.f32 %v785_v55 }
 0x8e3   : >> { %v1656_v56 = vpop.eup %1655 }
 0x8e4   : >> { %v787_v57 = vmul.f32 0.0625, %v1656_v56 }
 0x8e6   : >> { %v789_v58 = vmul.f32 %v2315_v53, %v787_v57  ;;  %v788_v59 = vmul.f32 %v2313_v52, %v787_v57 }
 0x8e8   : >> { %v793_v60 = vsel %vm316_vm0, %v789_v58, 0.0  ;;  %v790_v61 = vsel %vm316_vm0, %v788_v59, 0.0 }
 0x8e9   : >> { %794 = vadd.xlane.f32.xlu1 %v793_v60  ;;  %791 = vadd.xlane.f32.xlu0 %v790_v61 }
 0x976   : >> { %v795_v62 = vpop.xlane.xlu1 %794  ;;  %v792_v63 = vpop.xlane.xlu0 %791 }
 0x977   : >> { %v797_v3 = vmax.f32 %v795_v62, 1e-30  ;;  %v796_v4 = vmax.f32 %v792_v63, 1e-30 }
 0x979   : >> { %v799_v6 = vmin.f32 %v797_v3, 1e+30  ;;  %v798_v7 = vmin.f32 %v796_v4, 1e+30 }
 0x97b   : >> { %1657 = vrcp.f32 %v799_v6 }
 0x97c   : >> { %1659 = vrcp.f32 %v798_v7 }
 0x985   : >> { %v1658_v8 = vpop.eup %1657 }
 0x986   : >> { %v1660_v9 = vpop.eup %1659  ;;  %v803_v10 = vmul.f32 0.0625, %v1658_v8 }
 0x987   : >> { %v801_v11 = vmul.f32 0.0625, %v1660_v9 }
 0x988   : >> { %v805_v12 = vmul.f32 %v2315_v53, %v803_v10 }
 0x989   : >> { %v804_v13 = vmul.f32 %v2313_v52, %v801_v11 }
 0x98a   : >> { %v807_v14 = vsel %vm316_vm0, %v805_v12, 0.0 }
 0x98b   : >> { %v806_v15 = vsel %vm316_vm0, %v804_v13, 0.0 }
 0x98c   : >> { %v808_v16 = vadd.f32 %v807_v14, %v806_v15 }
 0x98e   : >> { %v809_v17 = vrot.slane %v808_v16, 4 }
 0x990   : >> { %v810_v18 = vadd.f32 %v809_v17, %v808_v16 }
 0x992   : >> { %v811_v20 = vrot.slane %v810_v18, 2 }
 0x994   : >> { %v812_v21 = vadd.f32 %v811_v20, %v810_v18 }
 0x996   : >> { %v813_v22 = vrot.slane %v812_v21, 1 }
 0x998   : >> { %v814_v23 = vadd.f32 %v813_v22, %v812_v21 }
 0x99a   : >> { %v815_v24 = vmax.f32 %v814_v23, 1e-30 }
 0x99c   : >> { %v816_v25 = vmin.f32 %v815_v24, 1e+30 }
 0x99e   : >> { %1661 = vrcp.f32 %v816_v25 }
 0x9a8   : >> { %v1662_v26 = vpop.eup %1661 }
 0x9a9   : >> { %v818_v27 = vmul.f32 0.0625, %v1662_v26 }
 0x9ab   : >> { %v820_v28 = vmul.f32 %v2315_v53, %v818_v27  ;;  %v819_v29 = vmul.f32 %v2313_v52, %v818_v27 }
 0x9ad   : >> { %v824_v30 = vsel %vm316_vm0, %v820_v28, 0.0  ;;  %v821_v31 = vsel %vm316_vm0, %v819_v29, 0.0 }
 0x9ae   : >> { %825 = vadd.xlane.f32.xlu1 %v824_v30  ;;  %822 = vadd.xlane.f32.xlu0 %v821_v31 }
 0xa3b   : >> { %v826_v32 = vpop.xlane.xlu1 %825  ;;  %v823_v33 = vpop.xlane.xlu0 %822 }
 0xa3c   : >> { %v828_v34 = vmax.f32 %v826_v32, 1e-30  ;;  %v827_v35 = vmax.f32 %v823_v33, 1e-30 }
 0xa3e   : >> { %v830_v36 = vmin.f32 %v828_v34, 1e+30  ;;  %v829_v37 = vmin.f32 %v827_v35, 1e+30 }
 0xa40   : >> { %1663 = vrcp.f32 %v830_v36 }
 0xa41   : >> { %1665 = vrcp.f32 %v829_v37 }
 0xa4a   : >> { %v1664_v38 = vpop.eup %1663 }
 0xa4b   : >> { %v1666_v39 = vpop.eup %1665  ;;  %v834_v41 = vmul.f32 0.0625, %v1664_v38 }
 0xa4c   : >> { %v832_v42 = vmul.f32 0.0625, %v1666_v39 }
 0xa4d   : >> { %v836_v44 = vmul.f32 %v2315_v53, %v834_v41 }
 0xa4e   : >> { %v835_v45 = vmul.f32 %v2313_v52, %v832_v42 }
 0xa4f   : >> { %v838_v48 = vsel %vm316_vm0, %v836_v44, 0.0 }
 0xa50   : >> { %v837_v49 = vsel %vm316_vm0, %v835_v45, 0.0 }
 0xa51   : >> { %v839_v50 = vadd.f32 %v838_v48, %v837_v49 }
 0xa53   : >> { %v840_v51 = vrot.slane %v839_v50, 4 }
 0xa55   : >> { %v841_v54 = vadd.f32 %v840_v51, %v839_v50 }
 0xa57   : >> { %v842_v55 = vrot.slane %v841_v54, 2 }
 0xa59   : >> { %v843_v56 = vadd.f32 %v842_v55, %v841_v54 }
 0xa5b   : >> { %v844_v57 = vrot.slane %v843_v56, 1 }
 0xa5d   : >> { %v845_v58 = vadd.f32 %v844_v57, %v843_v56 }
 0xa5f   : >> { %v846_v59 = vmax.f32 %v845_v58, 1e-30 }
 0xa61   : >> { %v847_v60 = vmin.f32 %v846_v59, 1e+30 }
 0xa63   : >> { %1667 = vrcp.f32 %v847_v60 }
 0xa6d   : >> { %v1668_v61 = vpop.eup %1667 }
 0xa6e   : >> { %v849_v62 = vmul.f32 0.0625, %v1668_v61 }
 0xa70   : >> { %v851_v63 = vmul.f32 %v2315_v53, %v849_v62  ;;  %1669 = vlog2.f32 %v849_v62  ;;  %v850_v3 = vmul.f32 %v2313_v52, %v849_v62 }
 0xa72   : >> { %v855_v4 = vsel %vm316_vm0, %v851_v63, 0.0  ;;  %v852_v6 = vsel %vm316_vm0, %v850_v3, 0.0 }
 0xa73   : >> { %856 = vadd.xlane.f32.xlu1 %v855_v4  ;;  %853 = vadd.xlane.f32.xlu0 %v852_v6 }
 0xa7a   : >> { %v1670_v7 = vpop.eup %1669 }
 0xa7b   : >> { %v873_v8 = vmul.f32 0.6931472, %v1670_v7 }
 0xa7d   : >> { %v2398_v19 = vadd.f32 %v1969_v19, %v873_v8  }
 0xa7f   : >> { %v2646_v9 = vmov %v2398_v19 }
 0xa80   : >> { %v2649_v19 = vmov %v2646_v9 }
 0xb00   : >> { %v857_v10 = vpop.xlane.xlu1 %856  ;;  %v854_v11 = vpop.xlane.xlu0 %853 }
 0xb01   : >> { %v859_v12 = vmax.f32 %v857_v10, 1e-30  ;;  %v858_v13 = vmax.f32 %v854_v11, 1e-30 }
 0xb03   : >> { %v861_v14 = vmin.f32 %v859_v12, 1e+30  ;;  %v860_v53 = vmin.f32 %v858_v13, 1e+30 }
 0xb05   : >> { %1671 = vrcp.f32 %v861_v14 }
 0xb06   : >> { %1673 = vrcp.f32 %v860_v53 }
 0xb0f   : >> { %v1672_v52 = vpop.eup %1671 }
 0xb10   : >> { %v1674_v15 = vpop.eup %1673  ;;  %v865_v16 = vmul.f32 0.0625, %v1672_v52 }
 0xb11   : >> { %v863_v17 = vmul.f32 0.0625, %v1674_v15 }
 0xb12   : >> { %1675 = vlog2.f32 %v865_v16 }
 0xb13   : >> { %1677 = vlog2.f32 %v863_v17 }
 0xb1c   : >> { %v1676_v18 = vpop.eup %1675 }
 0xb1d   : >> { %v1678_v20 = vpop.eup %1677  ;;  %v869_v21 = vmul.f32 0.6931472, %v1676_v18  ;;  %545 = sbr.rel (!%p543_p4) target bundleno = 843 (0x34b), region = 143 }
 0xb1e   : >> { %v867_v22 = vmul.f32 0.6931472, %v1678_v20 }
 0xb1f   : >> { %v2401_v43 = vadd.f32 %v1973_v43, %v869_v21  }
 0xb20   : >> { %v2404_v40 = vadd.f32 %v1977_v40, %v867_v22  }
 0xb21   : >> { %v2647_v23 = vmov %v2401_v43 }
 0xb22   : >> { %v2648_v24 = vmov %v2404_v40  ;;  %v2650_v43 = vmov %v2647_v23 }
 0xb23   : >> { %v2651_v40 = vmov %v2648_v24  ;;  %v875_v25 = vadd.f32 (%p543_p4), %v2648_v24, %v2246_v47 }
 0xb24   : > { %v876_v40 = vadd.f32 %v2647_v23, %v2244_v46 }
 0xb25   : > { %v877_v26 = vadd.f32 %v875_v25, %v2646_v9 }
 0xb26   : > { %v878_v27 = vadd.f32 %v876_v40, %v2646_v9 }
 0xb27   : > { %v879_v28 = vmul.f32 1.442695, %v877_v26 }
 0xb28   : > { %v881_v29 = vmul.f32 1.442695, %v878_v27 }
 0xb29   : > { %1679 = vpow2.f32 %v879_v28 }
 0xb2a   : > { %1681 = vpow2.f32 %v881_v29 }
 0xb33   : > { %v2426_v30 = vpop.eup %1679 }
 0xb34   : > { %v2428_v31 = vpop.eup %1681  ;;  %v883_v19 = vsel %vm316_vm0, %v2426_v30, 0.0 }
 0xb35   : > { %v884_v43 = vsel %vm316_vm0, %v2428_v31, 0.0 }
 0xb36   : > { %v885_v32 = vadd.f32 %v884_v43, %v883_v19 }
 0xb38   : > { %v886_v33 = vrot.slane %v885_v32, 4 }
 0xb3a   : > { %v887_v34 = vadd.f32 %v886_v33, %v885_v32 }
 0xb3c   : > { %v888_v35 = vrot.slane %v887_v34, 2 }
 0xb3e   : > { %v889_v36 = vadd.f32 %v888_v35, %v887_v34 }
 0xb40   : > { %v890_v37 = vrot.slane %v889_v36, 1 }
 0xb42   : > { %v891_v38 = vadd.f32 %v890_v37, %v889_v36 }
 0xb44   : > { %v892_v39 = vmax.f32 %v891_v38, 1e-30 }
 0xb46   : > { %v893_v41 = vmin.f32 %v892_v39, 1e+30 }
 0xb48   : > { %1683 = vrcp.f32 %v893_v41 }
 0xb52   : > { %v1684_v42 = vpop.eup %1683 }
 0xb53   : > { %v895_v44 = vmul.f32 0.0625, %v1684_v42 }
 0xb55   : > { %v896_v45 = vmul.f32 %v2426_v30, %v895_v44  ;;  %v897_v48 = vmul.f32 %v2428_v31, %v895_v44 }
 0xb57   : > { %v898_v49 = vsel %vm316_vm0, %v896_v45, 0.0  ;;  %v901_v50 = vsel %vm316_vm0, %v897_v48, 0.0 }
 0xb58   : > { %899 = vadd.xlane.f32.xlu0 %v898_v49 }
 0xb5c   : > { %902 = vadd.xlane.f32.xlu0 %v901_v50 }
 0xbe5   : > { %v900_v51 = vpop.xlane.xlu0 %899 }
 0xbe6   : > { %v904_v54 = vmax.f32 %v900_v51, 1e-30 }
 0xbe8   : > { %v906_v55 = vmin.f32 %v904_v54, 1e+30 }
 0xbe9   : > { %v903_v56 = vpop.xlane.xlu0 %902 }
 0xbea   : > { %1685 = vrcp.f32 %v906_v55  ;;  %v905_v57 = vmax.f32 %v903_v56, 1e-30 }
 0xbec   : > { %v907_v58 = vmin.f32 %v905_v57, 1e+30 }
 0xbee   : > { %1687 = vrcp.f32 %v907_v58 }
 0xbf4   : > { %v1686_v59 = vpop.eup %1685 }
 0xbf5   : > { %v909_v60 = vmul.f32 0.0625, %v1686_v59 }
 0xbf7   : > { %v912_v62 = vmul.f32 %v2426_v30, %v909_v60 }
 0xbf8   : > { %v1688_v61 = vpop.eup %1687 }
 0xbf9   : > { %v911_v63 = vmul.f32 0.0625, %v1688_v61  ;;  %v914_v4 = vsel %vm316_vm0, %v912_v62, 0.0 }
 0xbfb   : > { %v913_v3 = vmul.f32 %v2428_v31, %v911_v63 }
 0xbfd   : > { %v915_v6 = vsel %vm316_vm0, %v913_v3, 0.0 }
 0xbfe   : > { %v916_v7 = vadd.f32 %v915_v6, %v914_v4 }
 0xc00   : > { %v917_v8 = vrot.slane %v916_v7, 4 }
 0xc02   : > { %v918_v10 = vadd.f32 %v917_v8, %v916_v7 }
 0xc04   : > { %v919_v11 = vrot.slane %v918_v10, 2 }
 0xc06   : > { %v920_v12 = vadd.f32 %v919_v11, %v918_v10 }
 0xc08   : > { %v921_v13 = vrot.slane %v920_v12, 1 }
 0xc0a   : > { %v922_v14 = vadd.f32 %v921_v13, %v920_v12 }
 0xc0c   : > { %v923_v53 = vmax.f32 %v922_v14, 1e-30 }
 0xc0e   : > { %v924_v52 = vmin.f32 %v923_v53, 1e+30 }
 0xc10   : > { %1689 = vrcp.f32 %v924_v52 }
 0xc1a   : > { %v1690_v15 = vpop.eup %1689 }
 0xc1b   : > { %v926_v16 = vmul.f32 0.0625, %v1690_v15 }
 0xc1d   : > { %v927_v17 = vmul.f32 %v2426_v30, %v926_v16  ;;  %v928_v20 = vmul.f32 %v2428_v31, %v926_v16 }
 0xc1f   : > { %v929_v18 = vsel %vm316_vm0, %v927_v17, 0.0  ;;  %v932_v21 = vsel %vm316_vm0, %v928_v20, 0.0 }
 0xc20   : > { %930 = vadd.xlane.f32.xlu1 %v929_v18 }
 0xc24   : > { %933 = vadd.xlane.f32.xlu1 %v932_v21 }
 0xcad   : > { %v931_v22 = vpop.xlane.xlu1 %930 }
 0xcae   : > { %v935_v25 = vmax.f32 %v931_v22, 1e-30 }
 0xcb0   : > { %v937_v40 = vmin.f32 %v935_v25, 1e+30 }
 0xcb1   : > { %v934_v26 = vpop.xlane.xlu1 %933 }
 0xcb2   : > { %1691 = vrcp.f32 %v937_v40  ;;  %v936_v27 = vmax.f32 %v934_v26, 1e-30 }
 0xcb4   : > { %v938_v28 = vmin.f32 %v936_v27, 1e+30 }
 0xcb6   : > { %1693 = vrcp.f32 %v938_v28 }
 0xcbc   : > { %v1692_v29 = vpop.eup %1691 }
 0xcbd   : > { %v940_v19 = vmul.f32 0.0625, %v1692_v29 }
 0xcbf   : > { %v943_v32 = vmul.f32 %v2426_v30, %v940_v19 }
 0xcc0   : > { %v1694_v43 = vpop.eup %1693 }
 0xcc1   : > { %v942_v33 = vmul.f32 0.0625, %v1694_v43  ;;  %v945_v35 = vsel %vm316_vm0, %v943_v32, 0.0 }
 0xcc3   : > { %v944_v34 = vmul.f32 %v2428_v31, %v942_v33 }
 0xcc5   : > { %v946_v36 = vsel %vm316_vm0, %v944_v34, 0.0 }
 0xcc6   : > { %v947_v37 = vadd.f32 %v946_v36, %v945_v35 }
 0xcc8   : > { %v948_v38 = vrot.slane %v947_v37, 4 }
 0xcca   : > { %v949_v39 = vadd.f32 %v948_v38, %v947_v37 }
 0xccc   : > { %v950_v41 = vrot.slane %v949_v39, 2 }
 0xcce   : > { %v951_v42 = vadd.f32 %v950_v41, %v949_v39 }
 0xcd0   : > { %v952_v44 = vrot.slane %v951_v42, 1 }
 0xcd2   : > { %v953_v45 = vadd.f32 %v952_v44, %v951_v42 }
 0xcd4   : > { %v954_v48 = vmax.f32 %v953_v45, 1e-30 }
 0xcd6   : > { %v955_v49 = vmin.f32 %v954_v48, 1e+30 }
 0xcd8   : > { %1695 = vrcp.f32 %v955_v49 }
 0xce2   : > { %v1696_v50 = vpop.eup %1695 }
 0xce3   : > { %v957_v51 = vmul.f32 0.0625, %v1696_v50 }
 0xce5   : > { %v959_v54 = vmul.f32 %v2428_v31, %v957_v51  ;;  %v958_v55 = vmul.f32 %v2426_v30, %v957_v51 }
 0xce7   : > { %v963_v56 = vsel %vm316_vm0, %v959_v54, 0.0  ;;  %v960_v57 = vsel %vm316_vm0, %v958_v55, 0.0 }
 0xce8   : > { %964 = vadd.xlane.f32.xlu1 %v963_v56  ;;  %961 = vadd.xlane.f32.xlu0 %v960_v57 }
 0xd75   : > { %v965_v58 = vpop.xlane.xlu1 %964  ;;  %v962_v59 = vpop.xlane.xlu0 %961 }
 0xd76   : > { %v967_v60 = vmax.f32 %v965_v58, 1e-30  ;;  %v966_v61 = vmax.f32 %v962_v59, 1e-30 }
 0xd78   : > { %v969_v62 = vmin.f32 %v967_v60, 1e+30  ;;  %v968_v63 = vmin.f32 %v966_v61, 1e+30 }
 0xd7a   : > { %1697 = vrcp.f32 %v969_v62 }
 0xd7b   : > { %1699 = vrcp.f32 %v968_v63 }
 0xd84   : > { %v1698_v3 = vpop.eup %1697 }
 0xd85   : > { %v1700_v4 = vpop.eup %1699  ;;  %v973_v6 = vmul.f32 0.0625, %v1698_v3 }
 0xd86   : > { %v971_v7 = vmul.f32 0.0625, %v1700_v4 }
 0xd87   : > { %v975_v8 = vmul.f32 %v2428_v31, %v973_v6 }
 0xd88   : > { %v974_v10 = vmul.f32 %v2426_v30, %v971_v7 }
 0xd89   : > { %v977_v11 = vsel %vm316_vm0, %v975_v8, 0.0 }
 0xd8a   : > { %v976_v12 = vsel %vm316_vm0, %v974_v10, 0.0 }
 0xd8b   : > { %v978_v13 = vadd.f32 %v977_v11, %v976_v12 }
 0xd8d   : > { %v979_v14 = vrot.slane %v978_v13, 4 }
 0xd8f   : > { %v980_v53 = vadd.f32 %v979_v14, %v978_v13 }
 0xd91   : > { %v981_v52 = vrot.slane %v980_v53, 2 }
 0xd93   : > { %v982_v15 = vadd.f32 %v981_v52, %v980_v53 }
 0xd95   : > { %v983_v16 = vrot.slane %v982_v15, 1 }
 0xd97   : > { %v984_v17 = vadd.f32 %v983_v16, %v982_v15 }
 0xd99   : > { %v985_v18 = vmax.f32 %v984_v17, 1e-30 }
 0xd9b   : > { %v986_v20 = vmin.f32 %v985_v18, 1e+30 }
 0xd9d   : > { %1701 = vrcp.f32 %v986_v20 }
 0xda7   : > { %v1702_v21 = vpop.eup %1701 }
 0xda8   : > { %v988_v22 = vmul.f32 0.0625, %v1702_v21 }
 0xdaa   : > { %v990_v25 = vmul.f32 %v2428_v31, %v988_v22  ;;  %v989_v40 = vmul.f32 %v2426_v30, %v988_v22 }
 0xdac   : > { %v994_v26 = vsel %vm316_vm0, %v990_v25, 0.0  ;;  %v991_v27 = vsel %vm316_vm0, %v989_v40, 0.0 }
 0xdad   : > { %995 = vadd.xlane.f32.xlu1 %v994_v26  ;;  %992 = vadd.xlane.f32.xlu0 %v991_v27 }
 0xe3a   : > { %v996_v28 = vpop.xlane.xlu1 %995  ;;  %v993_v29 = vpop.xlane.xlu0 %992 }
 0xe3b   : > { %v998_v19 = vmax.f32 %v996_v28, 1e-30  ;;  %v997_v43 = vmax.f32 %v993_v29, 1e-30  ;;  %v1144_v28 = vstv %s1143_s20  ;;  %s2519_s20 = scalar_lea.hbm %s2633_s5, %s1434_s27 }
 0xe3d   : > { %v1000_v32 = vmin.f32 %v998_v19, 1e+30  ;;  %v999_v33 = vmin.f32 %v997_v43, 1e+30 }
 0xe3f   : > { %1703 = vrcp.f32 %v1000_v32 }
 0xe40   : > { %1705 = vrcp.f32 %v999_v33 }
 0xe49   : > { %v1704_v34 = vpop.eup %1703 }
 0xe4a   : > { %v1706_v35 = vpop.eup %1705  ;;  %v1004_v36 = vmul.f32 0.0625, %v1704_v34 }
 0xe4b   : > { %v1002_v37 = vmul.f32 0.0625, %v1706_v35 }
 0xe4c   : > { %v1006_v38 = vmul.f32 %v2428_v31, %v1004_v36 }
 0xe4d   : > { %v1005_v39 = vmul.f32 %v2426_v30, %v1002_v37 }
 0xe4e   : > { %v1008_v41 = vsel %vm316_vm0, %v1006_v38, 0.0 }
 0xe4f   : > { %v1007_v42 = vsel %vm316_vm0, %v1005_v39, 0.0 }
 0xe50   : > { %v1009_v44 = vadd.f32 %v1008_v41, %v1007_v42 }
 0xe52   : > { %v1010_v45 = vrot.slane %v1009_v44, 4 }
 0xe54   : > { %v1011_v48 = vadd.f32 %v1010_v45, %v1009_v44 }
 0xe56   : > { %v1012_v49 = vrot.slane %v1011_v48, 2 }
 0xe58   : > { %v1013_v50 = vadd.f32 %v1012_v49, %v1011_v48 }
 0xe5a   : > { %v1014_v51 = vrot.slane %v1013_v50, 1 }
 0xe5c   : > { %v1015_v54 = vadd.f32 %v1014_v51, %v1013_v50 }
 0xe5e   : > { %v1016_v55 = vmax.f32 %v1015_v54, 1e-30 }
 0xe60   : > { %v1017_v56 = vmin.f32 %v1016_v55, 1e+30 }
 0xe62   : > { %1707 = vrcp.f32 %v1017_v56 }
 0xe6c   : > { %v1708_v57 = vpop.eup %1707 }
 0xe6d   : > { %v1019_v58 = vmul.f32 0.0625, %v1708_v57 }
 0xe6f   : > { %v1021_v59 = vmul.f32 %v2428_v31, %v1019_v58  ;;  %v1020_v60 = vmul.f32 %v2426_v30, %v1019_v58 }
 0xe71   : > { %v1025_v61 = vsel %vm316_vm0, %v1021_v59, 0.0  ;;  %v1022_v62 = vsel %vm316_vm0, %v1020_v60, 0.0 }
 0xe72   : > { %1026 = vadd.xlane.f32.xlu1 %v1025_v61  ;;  %1023 = vadd.xlane.f32.xlu0 %v1022_v62 }
 0xeff   : > { %v1027_v63 = vpop.xlane.xlu1 %1026  ;;  %v1024_v3 = vpop.xlane.xlu0 %1023 }
 0xf00   : > { %v1029_v4 = vmax.f32 %v1027_v63, 1e-30  ;;  %v1028_v6 = vmax.f32 %v1024_v3, 1e-30 }
 0xf02   : > { %v1031_v7 = vmin.f32 %v1029_v4, 1e+30  ;;  %v1030_v8 = vmin.f32 %v1028_v6, 1e+30 }
 0xf04   : > { %1709 = vrcp.f32 %v1031_v7 }
 0xf05   : > { %1711 = vrcp.f32 %v1030_v8 }
 0xf06   : > { %1713 = vlog2.f32 %v1019_v58 }
 0xf0e   : > { %v1710_v10 = vpop.eup %1709 }
 0xf0f   : > { %v1712_v11 = vpop.eup %1711  ;;  %v1035_v31 = vmul.f32 0.0625, %v1710_v10 }
 0xf10   : > { %v1033_v12 = vmul.f32 0.0625, %v1712_v11  ;;  %v1714_v30 = vpop.eup %1713 }
 0xf11   : > { %1715 = vlog2.f32 %v1035_v31  ;;  %v1043_v53 = vmul.f32 0.6931472, %v1714_v30 }
 0xf12   : > { %1717 = vlog2.f32 %v1033_v12 }
 0xf13   : > { %v1044_v18 = vadd.f32 %v1043_v53, %v2646_v9  ;;  %v1156_v9 = vsub.f32 %v2229_v5, %v2220_v1 }
 0xf15   : > { %1158 = vst.msk [vmem:[%s2255_s22 + $0x8] sm:$0xff] %vm316_vm0, %v1156_v9 }
 0xf1b   : > { %v1716_v13 = vpop.eup %1715 }
 0xf1c   : > { %v1718_v14 = vpop.eup %1717  ;;  %v1039_v52 = vmul.f32 0.6931472, %v1716_v13 }
 0xf1d   : > { %v1037_v15 = vmul.f32 0.6931472, %v1718_v14 }
 0xf1e   : > { %v1041_v16 = vadd.f32 %v1039_v52, %v2647_v23 }
 0xf1f   : > { %v1040_v17 = vadd.f32 %v1037_v15, %v2648_v24  ;;  %v1140_v24 = vstv %s2216_s10  ;;  %s1797_s10 = sshll.u32 %s1989_s26, 4  ;;  %s1798_s10 = int_to_ptr.vmem [resolvable:$false] %s1797_s10 }
 0xf20   : > { %v1046_v20 = vadd.f32 %v1041_v16, %v2244_v46  ;;  %v1142_v29 = vmul.f32 %v1140_v24, %v2229_v5  ;;  %v1141_v43 = vmul.f32 %v1140_v24, %v2222_v2  ;;  %p1800_p12 = scmp.lt.s32.totalorder %s2501_s25, %s1798_s10 }
 0xf21   : > { %v1045_v21 = vadd.f32 %v1040_v17, %v2246_v47  ;;  %v1155_v47 = vsub.f32 %v2222_v2, %v2218_v0 }
 0xf22   : > { %v1048_v22 = vadd.f32 %v1046_v20, %v1044_v18 }
 0xf23   : > { %v1047_v25 = vadd.f32 %v1045_v21, %v1044_v18  ;;  %1157 = vst.msk [vmem:[%s2255_s22] sm:$0xff] %vm316_vm0, %v1155_v47 }
 0xf24   : > { %v1051_v40 = vmul.f32 1.442695, %v1048_v22 }
 0xf25   : > { %v1049_v26 = vmul.f32 1.442695, %v1047_v25 }
 0xf26   : > { %1719 = vpow2.f32 %v1051_v40 }
 0xf27   : > { %1721 = vpow2.f32 %v1049_v26 }
 0xf30   : > { %v1720_v23 = vpop.eup %1719 }
 0xf31   : > { %v1722_v27 = vpop.eup %1721 }
 0xf32   : > { %v1463_v46 = vpack.c.bf16 %v1720_v23, %v1722_v27 }
 0xf34   : > { %1465 = vmatprep.subr.msk.bf16.mxu1 %vm1464_vm1, %v1463_v46 }
 0xf35   : > { %1468 = vmatpush3.bf16.xpose.msk.msra.mxu1 %vm1464_vm1, %v1463_v46 }
 0xf3c   : > { %1457 = vmatmul.mubr.msk.f32.vlgmr.msra.gmra.mrb[0].mxu1 %vm316_vm0, %v2220_v1 }
0x100f   : > { %v1458_v19 = vpop.f32.mrb[0].mxu1 }
0x1010   : > { %v1146_v0 = vmul.f32 %v1458_v19, %v1144_v28  ;;  %v1131_v32 = vpop.f32.mrb[1].mxu1 }
0x1011   : > { %v1145_v1 = vmul.f32 %v1144_v28, %v1131_v32 }
0x1012   : > { %v1148_v33 = vadd.f32 %v1146_v0, %v1142_v29 }
0x1013   : > { %v1147_v34 = vadd.f32 %v1145_v1, %v1141_v43 }
0x1014   : > { %1150 = vst.msk [vmem:[%s2249_s13 + $0x8] sm:$0xff] %vm316_vm0, %v1148_v33  ;;  %v1152_v35 = vsub.f32 %v2229_v5, %v1148_v33 }
0x1015   : > { %1149 = vst.msk [vmem:[%s2249_s13] sm:$0xff] %vm316_vm0, %v1147_v34  ;;  %v1151_v36 = vsub.f32 %v2222_v2, %v1147_v34  ;;  %s1799_s13 = scalar_lea.vmem %s1798_s10, 512 }
0x1016   : > { %1154 = vst.msk [vmem:[%s2252_s12 + $0x8] sm:$0xff] %vm316_vm0, %v1152_v35  ;;  %p1801_p0 = scmp.lt.s32.totalorder %s1799_s13, %s1793_s17 }
0x1018   : > { %p1802_p6 = por %p1801_p0, %p1800_p12 }
0x101a   : > { %p1803_p11 = pnand %p1802_p6, %p1796_p10 }
0x101c   : > { %1806 = shalt.err (!%p1803_p11)
}
0x101d   : > { %s1807_s27 = scalar_lea.hbm %s2499_s16, 256  ;;  %s1811_s26 = scalar_lea.hbm %s2631_s3, 512 }
0x101e   : > { %p1808_p3 = scmp.ne.s32.totalorder %s2499_s16, %s1807_s27  ;;  %p1812_p9 = scmp.lt.u32.totalorder %s2499_s16, %s2631_s3 }
0x101f   : > { %p1813_p2 = scmp.lt.u32.totalorder %s1811_s26, %s1807_s27  ;;  %p1815_p1 = scmp.lt.u32.totalorder %s1807_s27, %s2499_s16 }
0x1020   : > { %p1809_p5 = pnand %p1808_p3, %p2652_p13 }
0x1021   : > { %p1814_p4 = por %p1813_p2, %p1812_p9 }
0x1022   : > { %p1810_p7 = pneg %p1809_p5 }
0x1023   : > { %p1816_p8 = por %p1815_p1, %p1814_p4 }
0x1025   : > { %p1817_p10 = pnand %p1816_p8, %p1810_p7 }
0x1027   : > { %1820 = shalt.err (!%p1817_p10)
}
0x1028   : > { %s1990_s17 = smov 128   ;;  %s1991_s13 = smov 8   ;;  %1153 = vst.msk [vmem:[%s2252_s12] sm:$0xff] %vm316_vm0, %v1151_v36 }
0x1029   : > { %1473 = dma.vmem_to_hbm [thread:$0]  (%p2652_p13), %s2501_s25, 256, %s2499_s16, %s1160_s24, %s1990_s17, %s1990_s17, %s1991_s13  }
0x102a   : > { %s2653_s18 = sand.u32 1, %s2057_s0   ;;  %s1821_s22 = scalar_lea.vmem %s2511_s7, 256 }
0x102b   : > { %s2556_s27 = scalar_lea.sflag [#allocation11], %s2653_s18  ;;  %p1822_p12 = scmp.ne.s32.totalorder %s2511_s7, %s1821_s22 }
0x102c   : > { %s1992_s21 = smov [#allocation10]  }
0x102d   : > { %p1823_p0 = pnand %p1822_p12, %p2652_p13  ;;  %s1825_s26 = sshll.u32 %s1992_s21, 4  ;;  %s1826_s26 = int_to_ptr.vmem [resolvable:$false] %s1825_s26 }
0x102e   : > { %s1827_s10 = scalar_lea.vmem %s1826_s26, 512  ;;  %p1828_p11 = scmp.lt.s32.totalorder %s2511_s7, %s1826_s26 }
0x102f   : > { %p1824_p6 = pneg %p1823_p0  ;;  %p1829_p3 = scmp.lt.s32.totalorder %s1827_s10, %s1821_s22 }
0x1031   : > { %p1830_p5 = por %p1829_p3, %p1828_p11 }
0x1033   : > { %p1831_p7 = pnand %p1830_p5, %p1824_p6 }
0x1035   : > { %1834 = shalt.err (!%p1831_p7)
}
0x1036   : > { %s1835_s0 = scalar_lea.hbm %s2509_s9, 256  ;;  %s1839_s25 = scalar_lea.hbm %s2632_s4, 512 }
0x1037   : > { %p1836_p9 = scmp.ne.s32.totalorder %s2509_s9, %s1835_s0  ;;  %p1840_p1 = scmp.lt.u32.totalorder %s2509_s9, %s2632_s4 }
0x1038   : > { %p1841_p8 = scmp.lt.u32.totalorder %s1839_s25, %s1835_s0  ;;  %p1843_p12 = scmp.lt.u32.totalorder %s1835_s0, %s2509_s9 }
0x1039   : > { %p1837_p2 = pnand %p1836_p9, %p2652_p13 }
0x103a   : > { %p1842_p10 = por %p1841_p8, %p1840_p1 }
0x103b   : > { %p1838_p4 = pneg %p1837_p2 }
0x103c   : > { %p1844_p0 = por %p1843_p12, %p1842_p10 }
0x103e   : > { %p1845_p6 = pnand %p1844_p0, %p1838_p4 }
0x1040   : > { %1848 = shalt.err (!%p1845_p6)
}
0x1041   : > { %1474 = dma.vmem_to_hbm [thread:$0]  (%p2652_p13), %s2511_s7, 256, %s2509_s9, %s2556_s27, %s1990_s17, %s1990_s17, %s1991_s13  }
0x1042   : > { %s1849_s18 = scalar_lea.vmem %s2521_s19, 256  ;;  %s1993_s22 = smov [#allocation12]  }
0x1043   : > { %p1850_p11 = scmp.ne.s32.totalorder %s2521_s19, %s1849_s18  ;;  %s1853_s21 = sshll.u32 %s1993_s22, 4  ;;  %s1854_s21 = int_to_ptr.vmem [resolvable:$false] %s1853_s21 }
0x1044   : > { %s1855_s26 = scalar_lea.vmem %s1854_s21, 512  ;;  %p1856_p7 = scmp.lt.s32.totalorder %s2521_s19, %s1854_s21 }
0x1045   : > { %p1851_p3 = pnand %p1850_p11, %p2652_p13  ;;  %p1857_p9 = scmp.lt.s32.totalorder %s1855_s26, %s1849_s18 }
0x1047   : > { %p1852_p5 = pneg %p1851_p3  ;;  %p1858_p2 = por %p1857_p9, %p1856_p7 }
0x1049   : > { %p1859_p4 = pnand %p1858_p2, %p1852_p5 }
0x104b   : > { %1862 = shalt.err (!%p1859_p4)
}
0x104c   : > { %s1863_s7 = scalar_lea.hbm %s2519_s20, 256  ;;  %s1867_s0 = scalar_lea.hbm %s2633_s5, 512 }
0x104d   : > { %p1864_p1 = scmp.ne.s32.totalorder %s2519_s20, %s1863_s7  ;;  %p1868_p12 = scmp.lt.u32.totalorder %s2519_s20, %s2633_s5 }
0x104e   : > { %p1869_p0 = scmp.lt.u32.totalorder %s1867_s0, %s1863_s7  ;;  %p1871_p11 = scmp.lt.u32.totalorder %s1863_s7, %s2519_s20 }
0x104f   : > { %p1865_p8 = pnand %p1864_p1, %p2652_p13 }
0x1050   : > { %p1870_p6 = por %p1869_p0, %p1868_p12 }
0x1051   : > { %p1866_p10 = pneg %p1865_p8 }
0x1052   : > { %p1872_p3 = por %p1871_p11, %p1870_p6 }
0x1054   : > { %p1873_p5 = pnand %p1872_p3, %p1866_p10 }
0x1056   : > { %1876 = shalt.err (!%p1873_p5)
}
0x1057   : > { %1475 = dma.vmem_to_hbm [thread:$0]  (%p2652_p13), %s2521_s19, 256, %s2519_s20, %s2556_s27, %s1990_s17, %s1990_s17, %s1991_s13  }
0x1058 PF: > { %s1230_s25 = sand.u32 1, %s1941_s28   ;;  %p2654_p7 = scmp.ne.s32.totalorder %s2640_s15, 0 }
0x1059   : > { %p2655_p9 = scmp.ge.s32.totalorder %s1953_s6, 2  ;;  %s1231_s16 = scalar_lea.sflag [#allocation6], %s1230_s25 }
0x105b   : > { %p1487_p2 = pnand %p2655_p9, %p2654_p7 }
0x105d   : > { %1932 = dma.done.wait (!%p1487_p2), %s1231_s16, 256  }
0x105e   : > { %1934 = vsyncadd (!%p1487_p2), %s1231_s16, 4294967040  ;;  %s2656_s14 = sadd.s32 4294967294, %s1953_s6  }
0x105f   : > { %s1239_s24 = sand.u32 1, %s2656_s14  }
0x1060   : > { %s1240_s18 = scalar_lea.sflag [#allocation11], %s1239_s24 }
0x1061   : > { %1936 = dma.done.wait (!%p1487_p2), %s1240_s18, 512  }
0x1062   : > { %1938 = vsyncadd (!%p1487_p2), %s1240_s18, 4294966784  ;;  %p29_p13 = scmp.ge.s32.totalorder %s2061_s8, 4   ;;  %s2657_s28 = smov %s1945_s29 }
0x1063   : > { %s2658_s29 = smov %s1949_s30  ;;  %s2659_s30 = smov %s2073_s11 }
0x1064   : > { %s2660_s6 = smov %s2061_s8  ;;  %31 = sbr.rel (!%p29_p13) target bundleno = 21 (0x15), region = 154 }
0x106b   :  { %1254 = vsyncpa [#allocation5], 1 }
0x106c   :  { %1256 = vsyncpa [#allocation5 + $0x1], 1 }
0x106d   :  { %1257 = vsyncpa [#allocation8], 1 }
0x106e   :  { %1259 = vsyncpa [#allocation8 + $0x1], 1 }
0x106f   :  { %1260 = vsyncpa [#allocation6], 1 }
0x1070   :  { %1262 = vsyncpa [#allocation6 + $0x1], 1 }
0x1071   :  { %1263 = vsyncpa [#allocation11], 1 }
0x1072   :  { %1265 = vsyncpa [#allocation11 + $0x1], 1 }

</bundles_post_ra>
